<compile_context>
chip_gen: v5e
topology: v5e:2x2
jax: 0.10.0
libtpu: 0.0.40
codegen_flags: <defaults>
</compile_context>

<pallas_src>
import functools

import jax
import jax.numpy as jnp
from jax.experimental import pallas as pl
from jax.experimental.pallas import tpu as pltpu

KERNEL_SIZE = 7
PAD = (KERNEL_SIZE - 1) // 2


def _round_up(v, m):
    return ((v + m - 1) // m) * m


def _pick_batch_block(N, max_nb=8):
    """Largest image block <= 8 dividing N, preferring >=2 blocks along the
    'parallel' grid axis so both v7x TensorCores get work."""
    divs = [d for d in range(1, min(N, max_nb) + 1) if N % d == 0]
    multi = [d for d in divs if N // d >= 2]
    return max(multi) if multi else max(divs)


def _pick_channel_block(C, row_bytes, sublane, budget_bytes):
    """Largest channel tile whose (Nb, Ct, HWp) x-block fits a per-buffer VMEM budget.
    Ct is a multiple of the dtype's native sublane pack (8 f32 / 16 bf16 / 32 int8)
    or the full C, so the BlockSpec satisfies the (8,128) tiling rule."""
    candidates = [ct for ct in range(1, C + 1)
                  if C % ct == 0 and (ct % sublane == 0 or ct == C)]
    fitting = [ct for ct in candidates if ct * row_bytes <= budget_bytes]
    return max(fitting) if fitting else min(candidates)


def _spatial_attention_kernel(w_ref, mh_ref, mw_ref, x_ref, o_ref,
                              sum_ref, max_ref, *, C, W, HWp, Nb, Ct):
    # w_ref  : SMEM (2*K*K,) f32 conv weights, flattened OIHW (O=1).
    # mh_ref : VMEM (K, HWp) f32 row-padding masks  (per kh).
    # mw_ref : VMEM (K, HWp) f32 col-padding masks  (per kw).
    # x_ref  : VMEM (Nb, Ct, HWp) channel tile of Nb images.
    # o_ref  : VMEM (Nb, 1, HWp)  sigmoid(conv) output (lane-dense store).
    # sum_ref/max_ref: VMEM (Nb, 8, HWp) f32 full-sublane running channel sum / max.
    K = KERNEL_SIZE
    c_step = pl.program_id(1)

    @pl.when(c_step == 0)
    def _init():
        sum_ref[...] = jnp.zeros_like(sum_ref)
        max_ref[...] = jnp.full(max_ref.shape, -jnp.inf, max_ref.dtype)

    # ---- channel-reduction step: pure vreg add/max into 8-sublane accumulators ----
    x = x_ref[...].astype(jnp.float32)                      # (Nb, Ct, HWp)
    s = sum_ref[...]
    m = max_ref[...]
    for c0 in range(0, Ct, 8):
        cw = min(8, Ct - c0)
        slab = x[:, c0:c0 + cw, :]
        if cw < 8:
            zpad = jnp.zeros((Nb, 8 - cw, HWp), jnp.float32)
            npad = jnp.full((Nb, 8 - cw, HWp), -jnp.inf, jnp.float32)
            s = s + jnp.concatenate([slab, zpad], axis=1)
            m = jnp.maximum(m, jnp.concatenate([slab, npad], axis=1))
        else:
            s = s + slab
            m = jnp.maximum(m, slab)
    sum_ref[...] = s
    max_ref[...] = m

    # ---- finalize: 7x7 conv over [avg, max] + sigmoid, entirely in vregs ----
    @pl.when(c_step == pl.num_programs(1) - 1)
    def _finalize():
        avg = jnp.sum(sum_ref[...], axis=1) * (1.0 / C)     # (Nb, HWp)
        mx = jnp.max(max_ref[...], axis=1)                  # (Nb, HWp)
        am = jnp.stack([avg, mx], axis=0)                   # (2, Nb, HWp)

        mh = mh_ref[...]                                    # (K, HWp) f32
        mw = mw_ref[...]                                    # (K, HWp) f32

        # Hoist all 98 scalar weight loads out of the tap loops.
        wgt = [[[w_ref[c * K * K + kh * K + kw] for kw in range(K)]
                for kh in range(K)] for c in range(2)]

        def lane_roll(v, delta):
            # out[..., p] = v[..., (p + delta) mod HWp]; wrapped entries masked below.
            if delta % HWp == 0:
                return v
            return pltpu.roll(v, (-delta) % HWp, v.ndim - 1)

        # Stage 1: one lane roll per kh covers both conv input channels; the
        # multiplicative mask implements the zero "same" padding along H.
        planes = []
        for kh in range(K):
            dh = kh - PAD
            planes.append(lane_roll(am, dh * W) * mh[kh].reshape(1, 1, HWp))

        # Stage 2: per kw, a pure-VPU weighted sum over (chan, kh), then a single
        # lane roll + zero-padding mask along W (skipped for the center tap dw=0).
        out = None
        for kw in range(K):
            dw = kw - PAD
            t = None
            for kh in range(K):
                contrib = (wgt[0][kh][kw] * planes[kh][0]
                           + wgt[1][kh][kw] * planes[kh][1])    # (Nb, HWp)
                t = contrib if t is None else t + contrib
            if dw == 0:
                term = t                                        # no roll, no mask needed
            else:
                term = lane_roll(t, dw) * mw[kw].reshape(1, HWp)
            out = term if out is None else out + term

        o_ref[...] = jax.nn.sigmoid(out).reshape(Nb, 1, HWp).astype(o_ref.dtype)


def spatial_attention(x, w, *, batch_block=None, channel_block=None):
    """x: (N, C, H, W), w: (1, 2, K, K) OIHW. Returns sigmoid(conv) of shape (N, 1, H, W)."""
    N, C, H, W = x.shape
    K = KERNEL_SIZE
    assert w.shape == (1, 2, K, K), w.shape
    HW = H * W
    HWp = _round_up(HW, 128)                     # lane-dense blocks for any H, W
    itemsize = x.dtype.itemsize

    x_flat = x.reshape(N, C, HW)                 # free, contiguous reshape
    if HWp != HW:
        x_flat = jnp.pad(x_flat, ((0, 0), (0, 0), (0, HWp - HW)))
    w_flat = w.reshape(-1).astype(jnp.float32)   # (2*K*K,), OIHW order

    # Multiplicative f32 padding masks:
    #   mask_h[kh, q] = [0 <= row(q) + (kh-PAD) < H],  mask_w[kw, p] = [0 <= col(p) + (kw-PAD) < W]
    pix = jnp.arange(HWp, dtype=jnp.int32)
    row = pix // W
    col = pix % W
    mask_h = jnp.stack(
        [((row + (kh - PAD) >= 0) & (row + (kh - PAD) < H)).astype(jnp.float32)
         for kh in range(K)])                    # (K, HWp)
    mask_w = jnp.stack(
        [((col + (kw - PAD) >= 0) & (col + (kw - PAD) < W)).astype(jnp.float32)
         for kw in range(K)])                    # (K, HWp)

    # Generation-aware VMEM budget (v5e/v6e: 128 MiB, v7x: 64 MiB).
    try:
        vmem_cap = int(pltpu.get_tpu_info().vmem_capacity_bytes)
    except Exception:
        vmem_cap = 64 << 20                      # conservative fallback (v7x-sized)
    buf_budget = max(2 << 20, vmem_cap // 8)     # per pipeline buffer (input is double-buffered)

    Nb = batch_block if batch_block is not None else _pick_batch_block(N)
    sublane = {4: 8, 2: 16, 1: 32}.get(itemsize, 8)
    Ct = channel_block if channel_block is not None else _pick_channel_block(
        C, Nb * HWp * itemsize, sublane, buf_budget)
    grid = (N // Nb, C // Ct)

    # Explicit scoped-VMEM limit: double-buffered blocks + scratch + headroom.
    need = (2 * Nb * Ct * HWp * itemsize + 2 * Nb * HWp * itemsize
            + 2 * Nb * 8 * HWp * 4 + 2 * 8 * HWp * 4 + (8 << 20))
    vmem_limit = int(min(max(32 << 20, need), int(vmem_cap * 0.9)))

    cost = pl.CostEstimate(
        flops=int(N) * HWp * (2 * C + 4 * K * K),
        transcendentals=int(N) * HWp,
        bytes_accessed=int(N * C * HWp * itemsize + N * HWp * itemsize
                           + 2 * K * HWp * 4 + 2 * K * K * 4),
    )

    kernel = functools.partial(_spatial_attention_kernel,
                               C=C, W=W, HWp=HWp, Nb=Nb, Ct=Ct)

    out_flat = pl.pallas_call(
        kernel,
        out_shape=jax.ShapeDtypeStruct((N, 1, HWp), x.dtype),
        grid_spec=pltpu.PrefetchScalarGridSpec(
            num_scalar_prefetch=0,
            grid=grid,
            in_specs=[
                pl.BlockSpec(memory_space=pltpu.MemorySpace.SMEM),     # conv weights
                pl.BlockSpec((K, HWp), lambda b, c: (0, 0)),           # mask_h
                pl.BlockSpec((K, HWp), lambda b, c: (0, 0)),           # mask_w
                pl.BlockSpec((Nb, Ct, HWp), lambda b, c: (b, c, 0)),   # x tile
            ],
            out_specs=pl.BlockSpec((Nb, 1, HWp), lambda b, c: (b, 0, 0)),
            scratch_shapes=[pltpu.VMEM((Nb, 8, HWp), jnp.float32),     # channel sum
                            pltpu.VMEM((Nb, 8, HWp), jnp.float32)],    # channel max
        ),
        compiler_params=pltpu.CompilerParams(
            dimension_semantics=("parallel", "arbitrary"),
            vmem_limit_bytes=vmem_limit),
        cost_estimate=cost,
    )(w_flat, mask_h, mask_w, x_flat)

    return out_flat[:, :, :HW].reshape(N, 1, H, W)


def spatial_attention_ref(x, w):
    avg = jnp.mean(x, axis=1, keepdims=True)
    mx = jnp.max(x, axis=1, keepdims=True)
    cat = jnp.concatenate([avg, mx], axis=1)
    out = jax.lax.conv_general_dilated(
        cat, w, window_strides=(1, 1),
        padding=((PAD, PAD), (PAD, PAD)),
        dimension_numbers=("NCHW", "OIHW", "NCHW"),
        precision=jax.lax.Precision.HIGHEST)
    return jax.nn.sigmoid(out)


if __name__ == "__main__":
    key = jax.random.PRNGKey(0)
    kx, kw_key = jax.random.split(key)

    N, C, H, W = 2, 4, 16, 16
    x = jax.random.normal(kx, (N, C, H, W), dtype=jnp.float32)
    # Conv weight shaped like nn.Conv2d(2, 1, 7, bias=False).
    fan_in = 2 * KERNEL_SIZE * KERNEL_SIZE
    bound = 1.0 / float(fan_in) ** 0.5
    w = jax.random.uniform(kw_key, (1, 2, KERNEL_SIZE, KERNEL_SIZE),
                           dtype=jnp.float32, minval=-bound, maxval=bound)

    out = jax.block_until_ready(spatial_attention(x, w))
    ref = jax.block_until_ready(spatial_attention_ref(x, w))

    assert out.shape == (N, 1, H, W), out.shape
    err = float(jnp.max(jnp.abs(out - ref)))
    assert jnp.allclose(out, ref, atol=2e-5, rtol=2e-5), f"max abs err = {err}"
    print("KERNEL_OK")
</pallas_src>

<mosaic_0001>
module attributes {stable_mosaic.version = 11 : i64} {
  func.func @_spatial_attention_kernel(%arg0: i32, %arg1: i32, %arg2: memref<98xf32, #tpu.memory_space<smem>>, %arg3: memref<7x256xf32, #tpu.memory_space<vmem>>, %arg4: memref<7x256xf32, #tpu.memory_space<vmem>>, %arg5: memref<1x4x256xf32, #tpu.memory_space<vmem>>, %arg6: memref<1x1x256xf32, #tpu.memory_space<vmem>>, %arg7: memref<1x8x256xf32, #tpu.memory_space<vmem>>, %arg8: memref<1x8x256xf32, #tpu.memory_space<vmem>>) attributes {dimension_semantics = [#tpu.dimension_semantics<parallel>, #tpu.dimension_semantics<arbitrary>], iteration_bounds = array<i64: 2, 1>, scalar_prefetch = 0 : i64, scratch_operands = 2 : i64, tpu.core_type = #tpu.core_type<tc>, window_params = [{transform_indices = @transform_0, window_bounds = array<i64: 98>}, {pipeline_mode = #tpu.pipeline_mode<synchronous>, transform_indices = @transform_1, window_bounds = array<i64: 7, 256>}, {pipeline_mode = #tpu.pipeline_mode<synchronous>, transform_indices = @transform_2, window_bounds = array<i64: 7, 256>}, {transform_indices = @transform_3, window_bounds = array<i64: 1, 4, 256>}, {transform_indices = @transform_4, window_bounds = array<i64: 1, 1, 256>}]} {
    %c0_i32 = arith.constant 0 : i32
    %0 = arith.cmpi eq, %arg1, %c0_i32 : i32
    %1 = arith.extui %0 : i1 to i32
    %c0_i32_0 = arith.constant 0 : i32
    %2 = arith.cmpi ne, %1, %c0_i32_0 : i32
    scf.if %2 {
      %cst_18 = arith.constant 0.000000e+00 : f32
      %17 = vector.broadcast %cst_18 : f32 to vector<1x8x256xf32>
      %c0_19 = arith.constant 0 : index
      %c0_20 = arith.constant 0 : index
      %c0_21 = arith.constant 0 : index
      %18 = vector.load %arg7[%c0_19, %c0_20, %c0_21] : memref<1x8x256xf32, #tpu.memory_space<vmem>>, vector<1x8x256xf32>
      tpu.vector_store %arg7[%c0_19, %c0_20, %c0_21], %17 {strides = array<i32>} : memref<1x8x256xf32, #tpu.memory_space<vmem>>, vector<1x8x256xf32>,
      %cst_22 = arith.constant 0xFF800000 : f32
      %19 = vector.broadcast %cst_22 : f32 to vector<1x8x256xf32>
      %c0_23 = arith.constant 0 : index
      %c0_24 = arith.constant 0 : index
      %c0_25 = arith.constant 0 : index
      %20 = vector.load %arg8[%c0_23, %c0_24, %c0_25] : memref<1x8x256xf32, #tpu.memory_space<vmem>>, vector<1x8x256xf32>
      tpu.vector_store %arg8[%c0_23, %c0_24, %c0_25], %19 {strides = array<i32>} : memref<1x8x256xf32, #tpu.memory_space<vmem>>, vector<1x8x256xf32>,
    } else {
    }
    %c0 = arith.constant 0 : index
    %c0_1 = arith.constant 0 : index
    %c0_2 = arith.constant 0 : index
    %3 = vector.load %arg5[%c0, %c0_1, %c0_2] : memref<1x4x256xf32, #tpu.memory_space<vmem>>, vector<1x4x256xf32>
    %c0_3 = arith.constant 0 : index
    %c0_4 = arith.constant 0 : index
    %c0_5 = arith.constant 0 : index
    %4 = vector.load %arg7[%c0_3, %c0_4, %c0_5] : memref<1x8x256xf32, #tpu.memory_space<vmem>>, vector<1x8x256xf32>
    %c0_6 = arith.constant 0 : index
    %c0_7 = arith.constant 0 : index
    %c0_8 = arith.constant 0 : index
    %5 = vector.load %arg8[%c0_6, %c0_7, %c0_8] : memref<1x8x256xf32, #tpu.memory_space<vmem>>, vector<1x8x256xf32>
    %cst = arith.constant 0.000000e+00 : f32
    %6 = vector.broadcast %cst : f32 to vector<1x4x256xf32>
    %cst_9 = arith.constant 0xFF800000 : f32
    %7 = vector.broadcast %cst_9 : f32 to vector<1x4x256xf32>
    %8 = tpu.concatenate %3, %6 in 1 : vector<1x4x256xf32>, vector<1x4x256xf32> -> vector<1x8x256xf32>
    %9 = arith.addf %4, %8 : vector<1x8x256xf32>
    %10 = tpu.concatenate %3, %7 in 1 : vector<1x4x256xf32>, vector<1x4x256xf32> -> vector<1x8x256xf32>
    %11 = arith.maximumf %5, %10 : vector<1x8x256xf32>
    %c0_10 = arith.constant 0 : index
    %c0_11 = arith.constant 0 : index
    %c0_12 = arith.constant 0 : index
    %12 = vector.load %arg7[%c0_10, %c0_11, %c0_12] : memref<1x8x256xf32, #tpu.memory_space<vmem>>, vector<1x8x256xf32>
    tpu.vector_store %arg7[%c0_10, %c0_11, %c0_12], %9 {strides = array<i32>} : memref<1x8x256xf32, #tpu.memory_space<vmem>>, vector<1x8x256xf32>,
    %c0_13 = arith.constant 0 : index
    %c0_14 = arith.constant 0 : index
    %c0_15 = arith.constant 0 : index
    %13 = vector.load %arg8[%c0_13, %c0_14, %c0_15] : memref<1x8x256xf32, #tpu.memory_space<vmem>>, vector<1x8x256xf32>
    tpu.vector_store %arg8[%c0_13, %c0_14, %c0_15], %11 {strides = array<i32>} : memref<1x8x256xf32, #tpu.memory_space<vmem>>, vector<1x8x256xf32>,
    %c0_i32_16 = arith.constant 0 : i32
    %14 = arith.cmpi eq, %arg1, %c0_i32_16 : i32
    %15 = arith.extui %14 : i1 to i32
    %c0_i32_17 = arith.constant 0 : i32
    %16 = arith.cmpi ne, %15, %c0_i32_17 : i32
    scf.if %16 {
      %c0_18 = arith.constant 0 : index
      %c0_19 = arith.constant 0 : index
      %c0_20 = arith.constant 0 : index
      %17 = vector.load %arg7[%c0_18, %c0_19, %c0_20] : memref<1x8x256xf32, #tpu.memory_space<vmem>>, vector<1x8x256xf32>
      %cst_21 = arith.constant dense<0.000000e+00> : vector<1x256xf32>
      %18 = vector.multi_reduction <add>, %17, %cst_21 [1] : vector<1x8x256xf32> to vector<1x256xf32>
      %cst_22 = arith.constant 2.500000e-01 : f32
      %19 = vector.broadcast %cst_22 : f32 to vector<1x256xf32>
      %20 = arith.mulf %18, %19 : vector<1x256xf32>
      %c0_23 = arith.constant 0 : index
      %c0_24 = arith.constant 0 : index
      %c0_25 = arith.constant 0 : index
      %21 = vector.load %arg8[%c0_23, %c0_24, %c0_25] : memref<1x8x256xf32, #tpu.memory_space<vmem>>, vector<1x8x256xf32>
      %cst_26 = arith.constant dense<0xFF800000> : vector<1x256xf32>
      %22 = vector.multi_reduction <maximumf>, %21, %cst_26 [1] : vector<1x8x256xf32> to vector<1x256xf32>
      %23 = vector.shape_cast %20 : vector<1x256xf32> to vector<1x1x256xf32>
      %24 = vector.shape_cast %22 : vector<1x256xf32> to vector<1x1x256xf32>
      %25 = tpu.concatenate %23, %24 in 0 : vector<1x1x256xf32>, vector<1x1x256xf32> -> vector<2x1x256xf32>
      %c0_27 = arith.constant 0 : index
      %c0_28 = arith.constant 0 : index
      %26 = vector.load %arg3[%c0_27, %c0_28] : memref<7x256xf32, #tpu.memory_space<vmem>>, vector<7x256xf32>
      %c0_29 = arith.constant 0 : index
      %c0_30 = arith.constant 0 : index
      %27 = vector.load %arg4[%c0_29, %c0_30] : memref<7x256xf32, #tpu.memory_space<vmem>>, vector<7x256xf32>
      %c0_31 = arith.constant 0 : index
      %28 = memref.load %arg2[%c0_31] : memref<98xf32, #tpu.memory_space<smem>>
      %c1 = arith.constant 1 : index
      %29 = memref.load %arg2[%c1] : memref<98xf32, #tpu.memory_space<smem>>
      %c2 = arith.constant 2 : index
      %30 = memref.load %arg2[%c2] : memref<98xf32, #tpu.memory_space<smem>>
      %c3 = arith.constant 3 : index
      %31 = memref.load %arg2[%c3] : memref<98xf32, #tpu.memory_space<smem>>
      %c4 = arith.constant 4 : index
      %32 = memref.load %arg2[%c4] : memref<98xf32, #tpu.memory_space<smem>>
      %c5 = arith.constant 5 : index
      %33 = memref.load %arg2[%c5] : memref<98xf32, #tpu.memory_space<smem>>
      %c6 = arith.constant 6 : index
      %34 = memref.load %arg2[%c6] : memref<98xf32, #tpu.memory_space<smem>>
      %c7 = arith.constant 7 : index
      %35 = memref.load %arg2[%c7] : memref<98xf32, #tpu.memory_space<smem>>
      %c8 = arith.constant 8 : index
      %36 = memref.load %arg2[%c8] : memref<98xf32, #tpu.memory_space<smem>>
      %c9 = arith.constant 9 : index
      %37 = memref.load %arg2[%c9] : memref<98xf32, #tpu.memory_space<smem>>
      %c10 = arith.constant 10 : index
      %38 = memref.load %arg2[%c10] : memref<98xf32, #tpu.memory_space<smem>>
      %c11 = arith.constant 11 : index
      %39 = memref.load %arg2[%c11] : memref<98xf32, #tpu.memory_space<smem>>
      %c12 = arith.constant 12 : index
      %40 = memref.load %arg2[%c12] : memref<98xf32, #tpu.memory_space<smem>>
      %c13 = arith.constant 13 : index
      %41 = memref.load %arg2[%c13] : memref<98xf32, #tpu.memory_space<smem>>
      %c14 = arith.constant 14 : index
      %42 = memref.load %arg2[%c14] : memref<98xf32, #tpu.memory_space<smem>>
      %c15 = arith.constant 15 : index
      %43 = memref.load %arg2[%c15] : memref<98xf32, #tpu.memory_space<smem>>
      %c16 = arith.constant 16 : index
      %44 = memref.load %arg2[%c16] : memref<98xf32, #tpu.memory_space<smem>>
      %c17 = arith.constant 17 : index
      %45 = memref.load %arg2[%c17] : memref<98xf32, #tpu.memory_space<smem>>
      %c18 = arith.constant 18 : index
      %46 = memref.load %arg2[%c18] : memref<98xf32, #tpu.memory_space<smem>>
      %c19 = arith.constant 19 : index
      %47 = memref.load %arg2[%c19] : memref<98xf32, #tpu.memory_space<smem>>
      %c20 = arith.constant 20 : index
      %48 = memref.load %arg2[%c20] : memref<98xf32, #tpu.memory_space<smem>>
      %c21 = arith.constant 21 : index
      %49 = memref.load %arg2[%c21] : memref<98xf32, #tpu.memory_space<smem>>
      %c22 = arith.constant 22 : index
      %50 = memref.load %arg2[%c22] : memref<98xf32, #tpu.memory_space<smem>>
      %c23 = arith.constant 23 : index
      %51 = memref.load %arg2[%c23] : memref<98xf32, #tpu.memory_space<smem>>
      %c24 = arith.constant 24 : index
      %52 = memref.load %arg2[%c24] : memref<98xf32, #tpu.memory_space<smem>>
      %c25 = arith.constant 25 : index
      %53 = memref.load %arg2[%c25] : memref<98xf32, #tpu.memory_space<smem>>
      %c26 = arith.constant 26 : index
      %54 = memref.load %arg2[%c26] : memref<98xf32, #tpu.memory_space<smem>>
      %c27 = arith.constant 27 : index
      %55 = memref.load %arg2[%c27] : memref<98xf32, #tpu.memory_space<smem>>
      %c28 = arith.constant 28 : index
      %56 = memref.load %arg2[%c28] : memref<98xf32, #tpu.memory_space<smem>>
      %c29 = arith.constant 29 : index
      %57 = memref.load %arg2[%c29] : memref<98xf32, #tpu.memory_space<smem>>
      %c30 = arith.constant 30 : index
      %58 = memref.load %arg2[%c30] : memref<98xf32, #tpu.memory_space<smem>>
      %c31 = arith.constant 31 : index
      %59 = memref.load %arg2[%c31] : memref<98xf32, #tpu.memory_space<smem>>
      %c32 = arith.constant 32 : index
      %60 = memref.load %arg2[%c32] : memref<98xf32, #tpu.memory_space<smem>>
      %c33 = arith.constant 33 : index
      %61 = memref.load %arg2[%c33] : memref<98xf32, #tpu.memory_space<smem>>
      %c34 = arith.constant 34 : index
      %62 = memref.load %arg2[%c34] : memref<98xf32, #tpu.memory_space<smem>>
      %c35 = arith.constant 35 : index
      %63 = memref.load %arg2[%c35] : memref<98xf32, #tpu.memory_space<smem>>
      %c36 = arith.constant 36 : index
      %64 = memref.load %arg2[%c36] : memref<98xf32, #tpu.memory_space<smem>>
      %c37 = arith.constant 37 : index
      %65 = memref.load %arg2[%c37] : memref<98xf32, #tpu.memory_space<smem>>
      %c38 = arith.constant 38 : index
      %66 = memref.load %arg2[%c38] : memref<98xf32, #tpu.memory_space<smem>>
      %c39 = arith.constant 39 : index
      %67 = memref.load %arg2[%c39] : memref<98xf32, #tpu.memory_space<smem>>
      %c40 = arith.constant 40 : index
      %68 = memref.load %arg2[%c40] : memref<98xf32, #tpu.memory_space<smem>>
      %c41 = arith.constant 41 : index
      %69 = memref.load %arg2[%c41] : memref<98xf32, #tpu.memory_space<smem>>
      %c42 = arith.constant 42 : index
      %70 = memref.load %arg2[%c42] : memref<98xf32, #tpu.memory_space<smem>>
      %c43 = arith.constant 43 : index
      %71 = memref.load %arg2[%c43] : memref<98xf32, #tpu.memory_space<smem>>
      %c44 = arith.constant 44 : index
      %72 = memref.load %arg2[%c44] : memref<98xf32, #tpu.memory_space<smem>>
      %c45 = arith.constant 45 : index
      %73 = memref.load %arg2[%c45] : memref<98xf32, #tpu.memory_space<smem>>
      %c46 = arith.constant 46 : index
      %74 = memref.load %arg2[%c46] : memref<98xf32, #tpu.memory_space<smem>>
      %c47 = arith.constant 47 : index
      %75 = memref.load %arg2[%c47] : memref<98xf32, #tpu.memory_space<smem>>
      %c48 = arith.constant 48 : index
      %76 = memref.load %arg2[%c48] : memref<98xf32, #tpu.memory_space<smem>>
      %c49 = arith.constant 49 : index
      %77 = memref.load %arg2[%c49] : memref<98xf32, #tpu.memory_space<smem>>
      %c50 = arith.constant 50 : index
      %78 = memref.load %arg2[%c50] : memref<98xf32, #tpu.memory_space<smem>>
      %c51 = arith.constant 51 : index
      %79 = memref.load %arg2[%c51] : memref<98xf32, #tpu.memory_space<smem>>
      %c52 = arith.constant 52 : index
      %80 = memref.load %arg2[%c52] : memref<98xf32, #tpu.memory_space<smem>>
      %c53 = arith.constant 53 : index
      %81 = memref.load %arg2[%c53] : memref<98xf32, #tpu.memory_space<smem>>
      %c54 = arith.constant 54 : index
      %82 = memref.load %arg2[%c54] : memref<98xf32, #tpu.memory_space<smem>>
      %c55 = arith.constant 55 : index
      %83 = memref.load %arg2[%c55] : memref<98xf32, #tpu.memory_space<smem>>
      %c56 = arith.constant 56 : index
      %84 = memref.load %arg2[%c56] : memref<98xf32, #tpu.memory_space<smem>>
      %c57 = arith.constant 57 : index
      %85 = memref.load %arg2[%c57] : memref<98xf32, #tpu.memory_space<smem>>
      %c58 = arith.constant 58 : index
      %86 = memref.load %arg2[%c58] : memref<98xf32, #tpu.memory_space<smem>>
      %c59 = arith.constant 59 : index
      %87 = memref.load %arg2[%c59] : memref<98xf32, #tpu.memory_space<smem>>
      %c60 = arith.constant 60 : index
      %88 = memref.load %arg2[%c60] : memref<98xf32, #tpu.memory_space<smem>>
      %c61 = arith.constant 61 : index
      %89 = memref.load %arg2[%c61] : memref<98xf32, #tpu.memory_space<smem>>
      %c62 = arith.constant 62 : index
      %90 = memref.load %arg2[%c62] : memref<98xf32, #tpu.memory_space<smem>>
      %c63 = arith.constant 63 : index
      %91 = memref.load %arg2[%c63] : memref<98xf32, #tpu.memory_space<smem>>
      %c64 = arith.constant 64 : index
      %92 = memref.load %arg2[%c64] : memref<98xf32, #tpu.memory_space<smem>>
      %c65 = arith.constant 65 : index
      %93 = memref.load %arg2[%c65] : memref<98xf32, #tpu.memory_space<smem>>
      %c66 = arith.constant 66 : index
      %94 = memref.load %arg2[%c66] : memref<98xf32, #tpu.memory_space<smem>>
      %c67 = arith.constant 67 : index
      %95 = memref.load %arg2[%c67] : memref<98xf32, #tpu.memory_space<smem>>
      %c68 = arith.constant 68 : index
      %96 = memref.load %arg2[%c68] : memref<98xf32, #tpu.memory_space<smem>>
      %c69 = arith.constant 69 : index
      %97 = memref.load %arg2[%c69] : memref<98xf32, #tpu.memory_space<smem>>
      %c70 = arith.constant 70 : index
      %98 = memref.load %arg2[%c70] : memref<98xf32, #tpu.memory_space<smem>>
      %c71 = arith.constant 71 : index
      %99 = memref.load %arg2[%c71] : memref<98xf32, #tpu.memory_space<smem>>
      %c72 = arith.constant 72 : index
      %100 = memref.load %arg2[%c72] : memref<98xf32, #tpu.memory_space<smem>>
      %c73 = arith.constant 73 : index
      %101 = memref.load %arg2[%c73] : memref<98xf32, #tpu.memory_space<smem>>
      %c74 = arith.constant 74 : index
      %102 = memref.load %arg2[%c74] : memref<98xf32, #tpu.memory_space<smem>>
      %c75 = arith.constant 75 : index
      %103 = memref.load %arg2[%c75] : memref<98xf32, #tpu.memory_space<smem>>
      %c76 = arith.constant 76 : index
      %104 = memref.load %arg2[%c76] : memref<98xf32, #tpu.memory_space<smem>>
      %c77 = arith.constant 77 : index
      %105 = memref.load %arg2[%c77] : memref<98xf32, #tpu.memory_space<smem>>
      %c78 = arith.constant 78 : index
      %106 = memref.load %arg2[%c78] : memref<98xf32, #tpu.memory_space<smem>>
      %c79 = arith.constant 79 : index
      %107 = memref.load %arg2[%c79] : memref<98xf32, #tpu.memory_space<smem>>
      %c80 = arith.constant 80 : index
      %108 = memref.load %arg2[%c80] : memref<98xf32, #tpu.memory_space<smem>>
      %c81 = arith.constant 81 : index
      %109 = memref.load %arg2[%c81] : memref<98xf32, #tpu.memory_space<smem>>
      %c82 = arith.constant 82 : index
      %110 = memref.load %arg2[%c82] : memref<98xf32, #tpu.memory_space<smem>>
      %c83 = arith.constant 83 : index
      %111 = memref.load %arg2[%c83] : memref<98xf32, #tpu.memory_space<smem>>
      %c84 = arith.constant 84 : index
      %112 = memref.load %arg2[%c84] : memref<98xf32, #tpu.memory_space<smem>>
      %c85 = arith.constant 85 : index
      %113 = memref.load %arg2[%c85] : memref<98xf32, #tpu.memory_space<smem>>
      %c86 = arith.constant 86 : index
      %114 = memref.load %arg2[%c86] : memref<98xf32, #tpu.memory_space<smem>>
      %c87 = arith.constant 87 : index
      %115 = memref.load %arg2[%c87] : memref<98xf32, #tpu.memory_space<smem>>
      %c88 = arith.constant 88 : index
      %116 = memref.load %arg2[%c88] : memref<98xf32, #tpu.memory_space<smem>>
      %c89 = arith.constant 89 : index
      %117 = memref.load %arg2[%c89] : memref<98xf32, #tpu.memory_space<smem>>
      %c90 = arith.constant 90 : index
      %118 = memref.load %arg2[%c90] : memref<98xf32, #tpu.memory_space<smem>>
      %c91 = arith.constant 91 : index
      %119 = memref.load %arg2[%c91] : memref<98xf32, #tpu.memory_space<smem>>
      %c92 = arith.constant 92 : index
      %120 = memref.load %arg2[%c92] : memref<98xf32, #tpu.memory_space<smem>>
      %c93 = arith.constant 93 : index
      %121 = memref.load %arg2[%c93] : memref<98xf32, #tpu.memory_space<smem>>
      %c94 = arith.constant 94 : index
      %122 = memref.load %arg2[%c94] : memref<98xf32, #tpu.memory_space<smem>>
      %c95 = arith.constant 95 : index
      %123 = memref.load %arg2[%c95] : memref<98xf32, #tpu.memory_space<smem>>
      %c96 = arith.constant 96 : index
      %124 = memref.load %arg2[%c96] : memref<98xf32, #tpu.memory_space<smem>>
      %c97 = arith.constant 97 : index
      %125 = memref.load %arg2[%c97] : memref<98xf32, #tpu.memory_space<smem>>
      %c48_i32 = arith.constant 48 : i32
      %126 = tpu.dynamic_rotate %25 by %c48_i32 dim 2 : vector<2x1x256xf32>, i32 -> vector<2x1x256xf32>
      %127 = vector.extract_strided_slice %26 {offsets = [0, 0], sizes = [1, 256], strides = [1, 1]} : vector<7x256xf32> to vector<1x256xf32>
      %128 = vector.shape_cast %127 : vector<1x256xf32> to vector<256xf32>
      %129 = vector.shape_cast %128 : vector<256xf32> to vector<1x1x256xf32>
      %130 = vector.broadcast %129 : vector<1x1x256xf32> to vector<2x1x256xf32>
      %131 = arith.mulf %126, %130 : vector<2x1x256xf32>
      %c32_i32 = arith.constant 32 : i32
      %132 = tpu.dynamic_rotate %25 by %c32_i32 dim 2 : vector<2x1x256xf32>, i32 -> vector<2x1x256xf32>
      %133 = vector.extract_strided_slice %26 {offsets = [1, 0], sizes = [1, 256], strides = [1, 1]} : vector<7x256xf32> to vector<1x256xf32>
      %134 = vector.shape_cast %133 : vector<1x256xf32> to vector<256xf32>
      %135 = vector.shape_cast %134 : vector<256xf32> to vector<1x1x256xf32>
      %136 = vector.broadcast %135 : vector<1x1x256xf32> to vector<2x1x256xf32>
      %137 = arith.mulf %132, %136 : vector<2x1x256xf32>
      %c16_i32 = arith.constant 16 : i32
      %138 = tpu.dynamic_rotate %25 by %c16_i32 dim 2 : vector<2x1x256xf32>, i32 -> vector<2x1x256xf32>
      %139 = vector.extract_strided_slice %26 {offsets = [2, 0], sizes = [1, 256], strides = [1, 1]} : vector<7x256xf32> to vector<1x256xf32>
      %140 = vector.shape_cast %139 : vector<1x256xf32> to vector<256xf32>
      %141 = vector.shape_cast %140 : vector<256xf32> to vector<1x1x256xf32>
      %142 = vector.broadcast %141 : vector<1x1x256xf32> to vector<2x1x256xf32>
      %143 = arith.mulf %138, %142 : vector<2x1x256xf32>
      %144 = vector.extract_strided_slice %26 {offsets = [3, 0], sizes = [1, 256], strides = [1, 1]} : vector<7x256xf32> to vector<1x256xf32>
      %145 = vector.shape_cast %144 : vector<1x256xf32> to vector<256xf32>
      %146 = vector.shape_cast %145 : vector<256xf32> to vector<1x1x256xf32>
      %147 = vector.broadcast %146 : vector<1x1x256xf32> to vector<2x1x256xf32>
      %148 = arith.mulf %25, %147 : vector<2x1x256xf32>
      %c240_i32 = arith.constant 240 : i32
      %149 = tpu.dynamic_rotate %25 by %c240_i32 dim 2 : vector<2x1x256xf32>, i32 -> vector<2x1x256xf32>
      %150 = vector.extract_strided_slice %26 {offsets = [4, 0], sizes = [1, 256], strides = [1, 1]} : vector<7x256xf32> to vector<1x256xf32>
      %151 = vector.shape_cast %150 : vector<1x256xf32> to vector<256xf32>
      %152 = vector.shape_cast %151 : vector<256xf32> to vector<1x1x256xf32>
      %153 = vector.broadcast %152 : vector<1x1x256xf32> to vector<2x1x256xf32>
      %154 = arith.mulf %149, %153 : vector<2x1x256xf32>
      %c224_i32 = arith.constant 224 : i32
      %155 = tpu.dynamic_rotate %25 by %c224_i32 dim 2 : vector<2x1x256xf32>, i32 -> vector<2x1x256xf32>
      %156 = vector.extract_strided_slice %26 {offsets = [5, 0], sizes = [1, 256], strides = [1, 1]} : vector<7x256xf32> to vector<1x256xf32>
      %157 = vector.shape_cast %156 : vector<1x256xf32> to vector<256xf32>
      %158 = vector.shape_cast %157 : vector<256xf32> to vector<1x1x256xf32>
      %159 = vector.broadcast %158 : vector<1x1x256xf32> to vector<2x1x256xf32>
      %160 = arith.mulf %155, %159 : vector<2x1x256xf32>
      %c208_i32 = arith.constant 208 : i32
      %161 = tpu.dynamic_rotate %25 by %c208_i32 dim 2 : vector<2x1x256xf32>, i32 -> vector<2x1x256xf32>
      %162 = vector.extract_strided_slice %26 {offsets = [6, 0], sizes = [1, 256], strides = [1, 1]} : vector<7x256xf32> to vector<1x256xf32>
      %163 = vector.shape_cast %162 : vector<1x256xf32> to vector<256xf32>
      %164 = vector.shape_cast %163 : vector<256xf32> to vector<1x1x256xf32>
      %165 = vector.broadcast %164 : vector<1x1x256xf32> to vector<2x1x256xf32>
      %166 = arith.mulf %161, %165 : vector<2x1x256xf32>
      %167 = vector.extract_strided_slice %131 {offsets = [0, 0, 0], sizes = [1, 1, 256], strides = [1, 1, 1]} : vector<2x1x256xf32> to vector<1x1x256xf32>
      %168 = vector.shape_cast %167 : vector<1x1x256xf32> to vector<1x256xf32>
      %169 = vector.broadcast %28 : f32 to vector<1x256xf32>
      %170 = arith.mulf %169, %168 : vector<1x256xf32>
      %171 = vector.extract_strided_slice %131 {offsets = [1, 0, 0], sizes = [1, 1, 256], strides = [1, 1, 1]} : vector<2x1x256xf32> to vector<1x1x256xf32>
      %172 = vector.shape_cast %171 : vector<1x1x256xf32> to vector<1x256xf32>
      %173 = vector.broadcast %77 : f32 to vector<1x256xf32>
      %174 = arith.mulf %173, %172 : vector<1x256xf32>
      %175 = arith.addf %170, %174 : vector<1x256xf32>
      %176 = vector.extract_strided_slice %137 {offsets = [0, 0, 0], sizes = [1, 1, 256], strides = [1, 1, 1]} : vector<2x1x256xf32> to vector<1x1x256xf32>
      %177 = vector.shape_cast %176 : vector<1x1x256xf32> to vector<1x256xf32>
      %178 = vector.broadcast %35 : f32 to vector<1x256xf32>
      %179 = arith.mulf %178, %177 : vector<1x256xf32>
      %180 = vector.extract_strided_slice %137 {offsets = [1, 0, 0], sizes = [1, 1, 256], strides = [1, 1, 1]} : vector<2x1x256xf32> to vector<1x1x256xf32>
      %181 = vector.shape_cast %180 : vector<1x1x256xf32> to vector<1x256xf32>
      %182 = vector.broadcast %84 : f32 to vector<1x256xf32>
      %183 = arith.mulf %182, %181 : vector<1x256xf32>
      %184 = arith.addf %179, %183 : vector<1x256xf32>
      %185 = arith.addf %175, %184 : vector<1x256xf32>
      %186 = vector.extract_strided_slice %143 {offsets = [0, 0, 0], sizes = [1, 1, 256], strides = [1, 1, 1]} : vector<2x1x256xf32> to vector<1x1x256xf32>
      %187 = vector.shape_cast %186 : vector<1x1x256xf32> to vector<1x256xf32>
      %188 = vector.broadcast %42 : f32 to vector<1x256xf32>
      %189 = arith.mulf %188, %187 : vector<1x256xf32>
      %190 = vector.extract_strided_slice %143 {offsets = [1, 0, 0], sizes = [1, 1, 256], strides = [1, 1, 1]} : vector<2x1x256xf32> to vector<1x1x256xf32>
      %191 = vector.shape_cast %190 : vector<1x1x256xf32> to vector<1x256xf32>
      %192 = vector.broadcast %91 : f32 to vector<1x256xf32>
      %193 = arith.mulf %192, %191 : vector<1x256xf32>
      %194 = arith.addf %189, %193 : vector<1x256xf32>
      %195 = arith.addf %185, %194 : vector<1x256xf32>
      %196 = vector.extract_strided_slice %148 {offsets = [0, 0, 0], sizes = [1, 1, 256], strides = [1, 1, 1]} : vector<2x1x256xf32> to vector<1x1x256xf32>
      %197 = vector.shape_cast %196 : vector<1x1x256xf32> to vector<1x256xf32>
      %198 = vector.broadcast %49 : f32 to vector<1x256xf32>
      %199 = arith.mulf %198, %197 : vector<1x256xf32>
      %200 = vector.extract_strided_slice %148 {offsets = [1, 0, 0], sizes = [1, 1, 256], strides = [1, 1, 1]} : vector<2x1x256xf32> to vector<1x1x256xf32>
      %201 = vector.shape_cast %200 : vector<1x1x256xf32> to vector<1x256xf32>
      %202 = vector.broadcast %98 : f32 to vector<1x256xf32>
      %203 = arith.mulf %202, %201 : vector<1x256xf32>
      %204 = arith.addf %199, %203 : vector<1x256xf32>
      %205 = arith.addf %195, %204 : vector<1x256xf32>
      %206 = vector.extract_strided_slice %154 {offsets = [0, 0, 0], sizes = [1, 1, 256], strides = [1, 1, 1]} : vector<2x1x256xf32> to vector<1x1x256xf32>
      %207 = vector.shape_cast %206 : vector<1x1x256xf32> to vector<1x256xf32>
      %208 = vector.broadcast %56 : f32 to vector<1x256xf32>
      %209 = arith.mulf %208, %207 : vector<1x256xf32>
      %210 = vector.extract_strided_slice %154 {offsets = [1, 0, 0], sizes = [1, 1, 256], strides = [1, 1, 1]} : vector<2x1x256xf32> to vector<1x1x256xf32>
      %211 = vector.shape_cast %210 : vector<1x1x256xf32> to vector<1x256xf32>
      %212 = vector.broadcast %105 : f32 to vector<1x256xf32>
      %213 = arith.mulf %212, %211 : vector<1x256xf32>
      %214 = arith.addf %209, %213 : vector<1x256xf32>
      %215 = arith.addf %205, %214 : vector<1x256xf32>
      %216 = vector.extract_strided_slice %160 {offsets = [0, 0, 0], sizes = [1, 1, 256], strides = [1, 1, 1]} : vector<2x1x256xf32> to vector<1x1x256xf32>
      %217 = vector.shape_cast %216 : vector<1x1x256xf32> to vector<1x256xf32>
      %218 = vector.broadcast %63 : f32 to vector<1x256xf32>
      %219 = arith.mulf %218, %217 : vector<1x256xf32>
      %220 = vector.extract_strided_slice %160 {offsets = [1, 0, 0], sizes = [1, 1, 256], strides = [1, 1, 1]} : vector<2x1x256xf32> to vector<1x1x256xf32>
      %221 = vector.shape_cast %220 : vector<1x1x256xf32> to vector<1x256xf32>
      %222 = vector.broadcast %112 : f32 to vector<1x256xf32>
      %223 = arith.mulf %222, %221 : vector<1x256xf32>
      %224 = arith.addf %219, %223 : vector<1x256xf32>
      %225 = arith.addf %215, %224 : vector<1x256xf32>
      %226 = vector.extract_strided_slice %166 {offsets = [0, 0, 0], sizes = [1, 1, 256], strides = [1, 1, 1]} : vector<2x1x256xf32> to vector<1x1x256xf32>
      %227 = vector.shape_cast %226 : vector<1x1x256xf32> to vector<1x256xf32>
      %228 = vector.broadcast %70 : f32 to vector<1x256xf32>
      %229 = arith.mulf %228, %227 : vector<1x256xf32>
      %230 = vector.extract_strided_slice %166 {offsets = [1, 0, 0], sizes = [1, 1, 256], strides = [1, 1, 1]} : vector<2x1x256xf32> to vector<1x1x256xf32>
      %231 = vector.shape_cast %230 : vector<1x1x256xf32> to vector<1x256xf32>
      %232 = vector.broadcast %119 : f32 to vector<1x256xf32>
      %233 = arith.mulf %232, %231 : vector<1x256xf32>
      %234 = arith.addf %229, %233 : vector<1x256xf32>
      %235 = arith.addf %225, %234 : vector<1x256xf32>
      %c3_i32 = arith.constant 3 : i32
      %236 = tpu.dynamic_rotate %235 by %c3_i32 dim 1 : vector<1x256xf32>, i32 -> vector<1x256xf32>
      %237 = vector.extract_strided_slice %27 {offsets = [0, 0], sizes = [1, 256], strides = [1, 1]} : vector<7x256xf32> to vector<1x256xf32>
      %238 = vector.shape_cast %237 : vector<1x256xf32> to vector<256xf32>
      %239 = vector.shape_cast %238 : vector<256xf32> to vector<1x256xf32>
      %240 = arith.mulf %236, %239 : vector<1x256xf32>
      %241 = vector.extract_strided_slice %131 {offsets = [0, 0, 0], sizes = [1, 1, 256], strides = [1, 1, 1]} : vector<2x1x256xf32> to vector<1x1x256xf32>
      %242 = vector.shape_cast %241 : vector<1x1x256xf32> to vector<1x256xf32>
      %243 = vector.broadcast %29 : f32 to vector<1x256xf32>
      %244 = arith.mulf %243, %242 : vector<1x256xf32>
      %245 = vector.extract_strided_slice %131 {offsets = [1, 0, 0], sizes = [1, 1, 256], strides = [1, 1, 1]} : vector<2x1x256xf32> to vector<1x1x256xf32>
      %246 = vector.shape_cast %245 : vector<1x1x256xf32> to vector<1x256xf32>
      %247 = vector.broadcast %78 : f32 to vector<1x256xf32>
      %248 = arith.mulf %247, %246 : vector<1x256xf32>
      %249 = arith.addf %244, %248 : vector<1x256xf32>
      %250 = vector.extract_strided_slice %137 {offsets = [0, 0, 0], sizes = [1, 1, 256], strides = [1, 1, 1]} : vector<2x1x256xf32> to vector<1x1x256xf32>
      %251 = vector.shape_cast %250 : vector<1x1x256xf32> to vector<1x256xf32>
      %252 = vector.broadcast %36 : f32 to vector<1x256xf32>
      %253 = arith.mulf %252, %251 : vector<1x256xf32>
      %254 = vector.extract_strided_slice %137 {offsets = [1, 0, 0], sizes = [1, 1, 256], strides = [1, 1, 1]} : vector<2x1x256xf32> to vector<1x1x256xf32>
      %255 = vector.shape_cast %254 : vector<1x1x256xf32> to vector<1x256xf32>
      %256 = vector.broadcast %85 : f32 to vector<1x256xf32>
      %257 = arith.mulf %256, %255 : vector<1x256xf32>
      %258 = arith.addf %253, %257 : vector<1x256xf32>
      %259 = arith.addf %249, %258 : vector<1x256xf32>
      %260 = vector.extract_strided_slice %143 {offsets = [0, 0, 0], sizes = [1, 1, 256], strides = [1, 1, 1]} : vector<2x1x256xf32> to vector<1x1x256xf32>
      %261 = vector.shape_cast %260 : vector<1x1x256xf32> to vector<1x256xf32>
      %262 = vector.broadcast %43 : f32 to vector<1x256xf32>
      %263 = arith.mulf %262, %261 : vector<1x256xf32>
      %264 = vector.extract_strided_slice %143 {offsets = [1, 0, 0], sizes = [1, 1, 256], strides = [1, 1, 1]} : vector<2x1x256xf32> to vector<1x1x256xf32>
      %265 = vector.shape_cast %264 : vector<1x1x256xf32> to vector<1x256xf32>
      %266 = vector.broadcast %92 : f32 to vector<1x256xf32>
      %267 = arith.mulf %266, %265 : vector<1x256xf32>
      %268 = arith.addf %263, %267 : vector<1x256xf32>
      %269 = arith.addf %259, %268 : vector<1x256xf32>
      %270 = vector.extract_strided_slice %148 {offsets = [0, 0, 0], sizes = [1, 1, 256], strides = [1, 1, 1]} : vector<2x1x256xf32> to vector<1x1x256xf32>
      %271 = vector.shape_cast %270 : vector<1x1x256xf32> to vector<1x256xf32>
      %272 = vector.broadcast %50 : f32 to vector<1x256xf32>
      %273 = arith.mulf %272, %271 : vector<1x256xf32>
      %274 = vector.extract_strided_slice %148 {offsets = [1, 0, 0], sizes = [1, 1, 256], strides = [1, 1, 1]} : vector<2x1x256xf32> to vector<1x1x256xf32>
      %275 = vector.shape_cast %274 : vector<1x1x256xf32> to vector<1x256xf32>
      %276 = vector.broadcast %99 : f32 to vector<1x256xf32>
      %277 = arith.mulf %276, %275 : vector<1x256xf32>
      %278 = arith.addf %273, %277 : vector<1x256xf32>
      %279 = arith.addf %269, %278 : vector<1x256xf32>
      %280 = vector.extract_strided_slice %154 {offsets = [0, 0, 0], sizes = [1, 1, 256], strides = [1, 1, 1]} : vector<2x1x256xf32> to vector<1x1x256xf32>
      %281 = vector.shape_cast %280 : vector<1x1x256xf32> to vector<1x256xf32>
      %282 = vector.broadcast %57 : f32 to vector<1x256xf32>
      %283 = arith.mulf %282, %281 : vector<1x256xf32>
      %284 = vector.extract_strided_slice %154 {offsets = [1, 0, 0], sizes = [1, 1, 256], strides = [1, 1, 1]} : vector<2x1x256xf32> to vector<1x1x256xf32>
      %285 = vector.shape_cast %284 : vector<1x1x256xf32> to vector<1x256xf32>
      %286 = vector.broadcast %106 : f32 to vector<1x256xf32>
      %287 = arith.mulf %286, %285 : vector<1x256xf32>
      %288 = arith.addf %283, %287 : vector<1x256xf32>
      %289 = arith.addf %279, %288 : vector<1x256xf32>
      %290 = vector.extract_strided_slice %160 {offsets = [0, 0, 0], sizes = [1, 1, 256], strides = [1, 1, 1]} : vector<2x1x256xf32> to vector<1x1x256xf32>
      %291 = vector.shape_cast %290 : vector<1x1x256xf32> to vector<1x256xf32>
      %292 = vector.broadcast %64 : f32 to vector<1x256xf32>
      %293 = arith.mulf %292, %291 : vector<1x256xf32>
      %294 = vector.extract_strided_slice %160 {offsets = [1, 0, 0], sizes = [1, 1, 256], strides = [1, 1, 1]} : vector<2x1x256xf32> to vector<1x1x256xf32>
      %295 = vector.shape_cast %294 : vector<1x1x256xf32> to vector<1x256xf32>
      %296 = vector.broadcast %113 : f32 to vector<1x256xf32>
      %297 = arith.mulf %296, %295 : vector<1x256xf32>
      %298 = arith.addf %293, %297 : vector<1x256xf32>
      %299 = arith.addf %289, %298 : vector<1x256xf32>
      %300 = vector.extract_strided_slice %166 {offsets = [0, 0, 0], sizes = [1, 1, 256], strides = [1, 1, 1]} : vector<2x1x256xf32> to vector<1x1x256xf32>
      %301 = vector.shape_cast %300 : vector<1x1x256xf32> to vector<1x256xf32>
      %302 = vector.broadcast %71 : f32 to vector<1x256xf32>
      %303 = arith.mulf %302, %301 : vector<1x256xf32>
      %304 = vector.extract_strided_slice %166 {offsets = [1, 0, 0], sizes = [1, 1, 256], strides = [1, 1, 1]} : vector<2x1x256xf32> to vector<1x1x256xf32>
      %305 = vector.shape_cast %304 : vector<1x1x256xf32> to vector<1x256xf32>
      %306 = vector.broadcast %120 : f32 to vector<1x256xf32>
      %307 = arith.mulf %306, %305 : vector<1x256xf32>
      %308 = arith.addf %303, %307 : vector<1x256xf32>
      %309 = arith.addf %299, %308 : vector<1x256xf32>
      %c2_i32 = arith.constant 2 : i32
      %310 = tpu.dynamic_rotate %309 by %c2_i32 dim 1 : vector<1x256xf32>, i32 -> vector<1x256xf32>
      %311 = vector.extract_strided_slice %27 {offsets = [1, 0], sizes = [1, 256], strides = [1, 1]} : vector<7x256xf32> to vector<1x256xf32>
      %312 = vector.shape_cast %311 : vector<1x256xf32> to vector<256xf32>
      %313 = vector.shape_cast %312 : vector<256xf32> to vector<1x256xf32>
      %314 = arith.mulf %310, %313 : vector<1x256xf32>
      %315 = arith.addf %240, %314 : vector<1x256xf32>
      %316 = vector.extract_strided_slice %131 {offsets = [0, 0, 0], sizes = [1, 1, 256], strides = [1, 1, 1]} : vector<2x1x256xf32> to vector<1x1x256xf32>
      %317 = vector.shape_cast %316 : vector<1x1x256xf32> to vector<1x256xf32>
      %318 = vector.broadcast %30 : f32 to vector<1x256xf32>
      %319 = arith.mulf %318, %317 : vector<1x256xf32>
      %320 = vector.extract_strided_slice %131 {offsets = [1, 0, 0], sizes = [1, 1, 256], strides = [1, 1, 1]} : vector<2x1x256xf32> to vector<1x1x256xf32>
      %321 = vector.shape_cast %320 : vector<1x1x256xf32> to vector<1x256xf32>
      %322 = vector.broadcast %79 : f32 to vector<1x256xf32>
      %323 = arith.mulf %322, %321 : vector<1x256xf32>
      %324 = arith.addf %319, %323 : vector<1x256xf32>
      %325 = vector.extract_strided_slice %137 {offsets = [0, 0, 0], sizes = [1, 1, 256], strides = [1, 1, 1]} : vector<2x1x256xf32> to vector<1x1x256xf32>
      %326 = vector.shape_cast %325 : vector<1x1x256xf32> to vector<1x256xf32>
      %327 = vector.broadcast %37 : f32 to vector<1x256xf32>
      %328 = arith.mulf %327, %326 : vector<1x256xf32>
      %329 = vector.extract_strided_slice %137 {offsets = [1, 0, 0], sizes = [1, 1, 256], strides = [1, 1, 1]} : vector<2x1x256xf32> to vector<1x1x256xf32>
      %330 = vector.shape_cast %329 : vector<1x1x256xf32> to vector<1x256xf32>
      %331 = vector.broadcast %86 : f32 to vector<1x256xf32>
      %332 = arith.mulf %331, %330 : vector<1x256xf32>
      %333 = arith.addf %328, %332 : vector<1x256xf32>
      %334 = arith.addf %324, %333 : vector<1x256xf32>
      %335 = vector.extract_strided_slice %143 {offsets = [0, 0, 0], sizes = [1, 1, 256], strides = [1, 1, 1]} : vector<2x1x256xf32> to vector<1x1x256xf32>
      %336 = vector.shape_cast %335 : vector<1x1x256xf32> to vector<1x256xf32>
      %337 = vector.broadcast %44 : f32 to vector<1x256xf32>
      %338 = arith.mulf %337, %336 : vector<1x256xf32>
      %339 = vector.extract_strided_slice %143 {offsets = [1, 0, 0], sizes = [1, 1, 256], strides = [1, 1, 1]} : vector<2x1x256xf32> to vector<1x1x256xf32>
      %340 = vector.shape_cast %339 : vector<1x1x256xf32> to vector<1x256xf32>
      %341 = vector.broadcast %93 : f32 to vector<1x256xf32>
      %342 = arith.mulf %341, %340 : vector<1x256xf32>
      %343 = arith.addf %338, %342 : vector<1x256xf32>
      %344 = arith.addf %334, %343 : vector<1x256xf32>
      %345 = vector.extract_strided_slice %148 {offsets = [0, 0, 0], sizes = [1, 1, 256], strides = [1, 1, 1]} : vector<2x1x256xf32> to vector<1x1x256xf32>
      %346 = vector.shape_cast %345 : vector<1x1x256xf32> to vector<1x256xf32>
      %347 = vector.broadcast %51 : f32 to vector<1x256xf32>
      %348 = arith.mulf %347, %346 : vector<1x256xf32>
      %349 = vector.extract_strided_slice %148 {offsets = [1, 0, 0], sizes = [1, 1, 256], strides = [1, 1, 1]} : vector<2x1x256xf32> to vector<1x1x256xf32>
      %350 = vector.shape_cast %349 : vector<1x1x256xf32> to vector<1x256xf32>
      %351 = vector.broadcast %100 : f32 to vector<1x256xf32>
      %352 = arith.mulf %351, %350 : vector<1x256xf32>
      %353 = arith.addf %348, %352 : vector<1x256xf32>
      %354 = arith.addf %344, %353 : vector<1x256xf32>
      %355 = vector.extract_strided_slice %154 {offsets = [0, 0, 0], sizes = [1, 1, 256], strides = [1, 1, 1]} : vector<2x1x256xf32> to vector<1x1x256xf32>
      %356 = vector.shape_cast %355 : vector<1x1x256xf32> to vector<1x256xf32>
      %357 = vector.broadcast %58 : f32 to vector<1x256xf32>
      %358 = arith.mulf %357, %356 : vector<1x256xf32>
      %359 = vector.extract_strided_slice %154 {offsets = [1, 0, 0], sizes = [1, 1, 256], strides = [1, 1, 1]} : vector<2x1x256xf32> to vector<1x1x256xf32>
      %360 = vector.shape_cast %359 : vector<1x1x256xf32> to vector<1x256xf32>
      %361 = vector.broadcast %107 : f32 to vector<1x256xf32>
      %362 = arith.mulf %361, %360 : vector<1x256xf32>
      %363 = arith.addf %358, %362 : vector<1x256xf32>
      %364 = arith.addf %354, %363 : vector<1x256xf32>
      %365 = vector.extract_strided_slice %160 {offsets = [0, 0, 0], sizes = [1, 1, 256], strides = [1, 1, 1]} : vector<2x1x256xf32> to vector<1x1x256xf32>
      %366 = vector.shape_cast %365 : vector<1x1x256xf32> to vector<1x256xf32>
      %367 = vector.broadcast %65 : f32 to vector<1x256xf32>
      %368 = arith.mulf %367, %366 : vector<1x256xf32>
      %369 = vector.extract_strided_slice %160 {offsets = [1, 0, 0], sizes = [1, 1, 256], strides = [1, 1, 1]} : vector<2x1x256xf32> to vector<1x1x256xf32>
      %370 = vector.shape_cast %369 : vector<1x1x256xf32> to vector<1x256xf32>
      %371 = vector.broadcast %114 : f32 to vector<1x256xf32>
      %372 = arith.mulf %371, %370 : vector<1x256xf32>
      %373 = arith.addf %368, %372 : vector<1x256xf32>
      %374 = arith.addf %364, %373 : vector<1x256xf32>
      %375 = vector.extract_strided_slice %166 {offsets = [0, 0, 0], sizes = [1, 1, 256], strides = [1, 1, 1]} : vector<2x1x256xf32> to vector<1x1x256xf32>
      %376 = vector.shape_cast %375 : vector<1x1x256xf32> to vector<1x256xf32>
      %377 = vector.broadcast %72 : f32 to vector<1x256xf32>
      %378 = arith.mulf %377, %376 : vector<1x256xf32>
      %379 = vector.extract_strided_slice %166 {offsets = [1, 0, 0], sizes = [1, 1, 256], strides = [1, 1, 1]} : vector<2x1x256xf32> to vector<1x1x256xf32>
      %380 = vector.shape_cast %379 : vector<1x1x256xf32> to vector<1x256xf32>
      %381 = vector.broadcast %121 : f32 to vector<1x256xf32>
      %382 = arith.mulf %381, %380 : vector<1x256xf32>
      %383 = arith.addf %378, %382 : vector<1x256xf32>
      %384 = arith.addf %374, %383 : vector<1x256xf32>
      %c1_i32 = arith.constant 1 : i32
      %385 = tpu.dynamic_rotate %384 by %c1_i32 dim 1 : vector<1x256xf32>, i32 -> vector<1x256xf32>
      %386 = vector.extract_strided_slice %27 {offsets = [2, 0], sizes = [1, 256], strides = [1, 1]} : vector<7x256xf32> to vector<1x256xf32>
      %387 = vector.shape_cast %386 : vector<1x256xf32> to vector<256xf32>
      %388 = vector.shape_cast %387 : vector<256xf32> to vector<1x256xf32>
      %389 = arith.mulf %385, %388 : vector<1x256xf32>
      %390 = arith.addf %315, %389 : vector<1x256xf32>
      %391 = vector.extract_strided_slice %131 {offsets = [0, 0, 0], sizes = [1, 1, 256], strides = [1, 1, 1]} : vector<2x1x256xf32> to vector<1x1x256xf32>
      %392 = vector.shape_cast %391 : vector<1x1x256xf32> to vector<1x256xf32>
      %393 = vector.broadcast %31 : f32 to vector<1x256xf32>
      %394 = arith.mulf %393, %392 : vector<1x256xf32>
      %395 = vector.extract_strided_slice %131 {offsets = [1, 0, 0], sizes = [1, 1, 256], strides = [1, 1, 1]} : vector<2x1x256xf32> to vector<1x1x256xf32>
      %396 = vector.shape_cast %395 : vector<1x1x256xf32> to vector<1x256xf32>
      %397 = vector.broadcast %80 : f32 to vector<1x256xf32>
      %398 = arith.mulf %397, %396 : vector<1x256xf32>
      %399 = arith.addf %394, %398 : vector<1x256xf32>
      %400 = vector.extract_strided_slice %137 {offsets = [0, 0, 0], sizes = [1, 1, 256], strides = [1, 1, 1]} : vector<2x1x256xf32> to vector<1x1x256xf32>
      %401 = vector.shape_cast %400 : vector<1x1x256xf32> to vector<1x256xf32>
      %402 = vector.broadcast %38 : f32 to vector<1x256xf32>
      %403 = arith.mulf %402, %401 : vector<1x256xf32>
      %404 = vector.extract_strided_slice %137 {offsets = [1, 0, 0], sizes = [1, 1, 256], strides = [1, 1, 1]} : vector<2x1x256xf32> to vector<1x1x256xf32>
      %405 = vector.shape_cast %404 : vector<1x1x256xf32> to vector<1x256xf32>
      %406 = vector.broadcast %87 : f32 to vector<1x256xf32>
      %407 = arith.mulf %406, %405 : vector<1x256xf32>
      %408 = arith.addf %403, %407 : vector<1x256xf32>
      %409 = arith.addf %399, %408 : vector<1x256xf32>
      %410 = vector.extract_strided_slice %143 {offsets = [0, 0, 0], sizes = [1, 1, 256], strides = [1, 1, 1]} : vector<2x1x256xf32> to vector<1x1x256xf32>
      %411 = vector.shape_cast %410 : vector<1x1x256xf32> to vector<1x256xf32>
      %412 = vector.broadcast %45 : f32 to vector<1x256xf32>
      %413 = arith.mulf %412, %411 : vector<1x256xf32>
      %414 = vector.extract_strided_slice %143 {offsets = [1, 0, 0], sizes = [1, 1, 256], strides = [1, 1, 1]} : vector<2x1x256xf32> to vector<1x1x256xf32>
      %415 = vector.shape_cast %414 : vector<1x1x256xf32> to vector<1x256xf32>
      %416 = vector.broadcast %94 : f32 to vector<1x256xf32>
      %417 = arith.mulf %416, %415 : vector<1x256xf32>
      %418 = arith.addf %413, %417 : vector<1x256xf32>
      %419 = arith.addf %409, %418 : vector<1x256xf32>
      %420 = vector.extract_strided_slice %148 {offsets = [0, 0, 0], sizes = [1, 1, 256], strides = [1, 1, 1]} : vector<2x1x256xf32> to vector<1x1x256xf32>
      %421 = vector.shape_cast %420 : vector<1x1x256xf32> to vector<1x256xf32>
      %422 = vector.broadcast %52 : f32 to vector<1x256xf32>
      %423 = arith.mulf %422, %421 : vector<1x256xf32>
      %424 = vector.extract_strided_slice %148 {offsets = [1, 0, 0], sizes = [1, 1, 256], strides = [1, 1, 1]} : vector<2x1x256xf32> to vector<1x1x256xf32>
      %425 = vector.shape_cast %424 : vector<1x1x256xf32> to vector<1x256xf32>
      %426 = vector.broadcast %101 : f32 to vector<1x256xf32>
      %427 = arith.mulf %426, %425 : vector<1x256xf32>
      %428 = arith.addf %423, %427 : vector<1x256xf32>
      %429 = arith.addf %419, %428 : vector<1x256xf32>
      %430 = vector.extract_strided_slice %154 {offsets = [0, 0, 0], sizes = [1, 1, 256], strides = [1, 1, 1]} : vector<2x1x256xf32> to vector<1x1x256xf32>
      %431 = vector.shape_cast %430 : vector<1x1x256xf32> to vector<1x256xf32>
      %432 = vector.broadcast %59 : f32 to vector<1x256xf32>
      %433 = arith.mulf %432, %431 : vector<1x256xf32>
      %434 = vector.extract_strided_slice %154 {offsets = [1, 0, 0], sizes = [1, 1, 256], strides = [1, 1, 1]} : vector<2x1x256xf32> to vector<1x1x256xf32>
      %435 = vector.shape_cast %434 : vector<1x1x256xf32> to vector<1x256xf32>
      %436 = vector.broadcast %108 : f32 to vector<1x256xf32>
      %437 = arith.mulf %436, %435 : vector<1x256xf32>
      %438 = arith.addf %433, %437 : vector<1x256xf32>
      %439 = arith.addf %429, %438 : vector<1x256xf32>
      %440 = vector.extract_strided_slice %160 {offsets = [0, 0, 0], sizes = [1, 1, 256], strides = [1, 1, 1]} : vector<2x1x256xf32> to vector<1x1x256xf32>
      %441 = vector.shape_cast %440 : vector<1x1x256xf32> to vector<1x256xf32>
      %442 = vector.broadcast %66 : f32 to vector<1x256xf32>
      %443 = arith.mulf %442, %441 : vector<1x256xf32>
      %444 = vector.extract_strided_slice %160 {offsets = [1, 0, 0], sizes = [1, 1, 256], strides = [1, 1, 1]} : vector<2x1x256xf32> to vector<1x1x256xf32>
      %445 = vector.shape_cast %444 : vector<1x1x256xf32> to vector<1x256xf32>
      %446 = vector.broadcast %115 : f32 to vector<1x256xf32>
      %447 = arith.mulf %446, %445 : vector<1x256xf32>
      %448 = arith.addf %443, %447 : vector<1x256xf32>
      %449 = arith.addf %439, %448 : vector<1x256xf32>
      %450 = vector.extract_strided_slice %166 {offsets = [0, 0, 0], sizes = [1, 1, 256], strides = [1, 1, 1]} : vector<2x1x256xf32> to vector<1x1x256xf32>
      %451 = vector.shape_cast %450 : vector<1x1x256xf32> to vector<1x256xf32>
      %452 = vector.broadcast %73 : f32 to vector<1x256xf32>
      %453 = arith.mulf %452, %451 : vector<1x256xf32>
      %454 = vector.extract_strided_slice %166 {offsets = [1, 0, 0], sizes = [1, 1, 256], strides = [1, 1, 1]} : vector<2x1x256xf32> to vector<1x1x256xf32>
      %455 = vector.shape_cast %454 : vector<1x1x256xf32> to vector<1x256xf32>
      %456 = vector.broadcast %122 : f32 to vector<1x256xf32>
      %457 = arith.mulf %456, %455 : vector<1x256xf32>
      %458 = arith.addf %453, %457 : vector<1x256xf32>
      %459 = arith.addf %449, %458 : vector<1x256xf32>
      %460 = arith.addf %390, %459 : vector<1x256xf32>
      %461 = vector.extract_strided_slice %131 {offsets = [0, 0, 0], sizes = [1, 1, 256], strides = [1, 1, 1]} : vector<2x1x256xf32> to vector<1x1x256xf32>
      %462 = vector.shape_cast %461 : vector<1x1x256xf32> to vector<1x256xf32>
      %463 = vector.broadcast %32 : f32 to vector<1x256xf32>
      %464 = arith.mulf %463, %462 : vector<1x256xf32>
      %465 = vector.extract_strided_slice %131 {offsets = [1, 0, 0], sizes = [1, 1, 256], strides = [1, 1, 1]} : vector<2x1x256xf32> to vector<1x1x256xf32>
      %466 = vector.shape_cast %465 : vector<1x1x256xf32> to vector<1x256xf32>
      %467 = vector.broadcast %81 : f32 to vector<1x256xf32>
      %468 = arith.mulf %467, %466 : vector<1x256xf32>
      %469 = arith.addf %464, %468 : vector<1x256xf32>
      %470 = vector.extract_strided_slice %137 {offsets = [0, 0, 0], sizes = [1, 1, 256], strides = [1, 1, 1]} : vector<2x1x256xf32> to vector<1x1x256xf32>
      %471 = vector.shape_cast %470 : vector<1x1x256xf32> to vector<1x256xf32>
      %472 = vector.broadcast %39 : f32 to vector<1x256xf32>
      %473 = arith.mulf %472, %471 : vector<1x256xf32>
      %474 = vector.extract_strided_slice %137 {offsets = [1, 0, 0], sizes = [1, 1, 256], strides = [1, 1, 1]} : vector<2x1x256xf32> to vector<1x1x256xf32>
      %475 = vector.shape_cast %474 : vector<1x1x256xf32> to vector<1x256xf32>
      %476 = vector.broadcast %88 : f32 to vector<1x256xf32>
      %477 = arith.mulf %476, %475 : vector<1x256xf32>
      %478 = arith.addf %473, %477 : vector<1x256xf32>
      %479 = arith.addf %469, %478 : vector<1x256xf32>
      %480 = vector.extract_strided_slice %143 {offsets = [0, 0, 0], sizes = [1, 1, 256], strides = [1, 1, 1]} : vector<2x1x256xf32> to vector<1x1x256xf32>
      %481 = vector.shape_cast %480 : vector<1x1x256xf32> to vector<1x256xf32>
      %482 = vector.broadcast %46 : f32 to vector<1x256xf32>
      %483 = arith.mulf %482, %481 : vector<1x256xf32>
      %484 = vector.extract_strided_slice %143 {offsets = [1, 0, 0], sizes = [1, 1, 256], strides = [1, 1, 1]} : vector<2x1x256xf32> to vector<1x1x256xf32>
      %485 = vector.shape_cast %484 : vector<1x1x256xf32> to vector<1x256xf32>
      %486 = vector.broadcast %95 : f32 to vector<1x256xf32>
      %487 = arith.mulf %486, %485 : vector<1x256xf32>
      %488 = arith.addf %483, %487 : vector<1x256xf32>
      %489 = arith.addf %479, %488 : vector<1x256xf32>
      %490 = vector.extract_strided_slice %148 {offsets = [0, 0, 0], sizes = [1, 1, 256], strides = [1, 1, 1]} : vector<2x1x256xf32> to vector<1x1x256xf32>
      %491 = vector.shape_cast %490 : vector<1x1x256xf32> to vector<1x256xf32>
      %492 = vector.broadcast %53 : f32 to vector<1x256xf32>
      %493 = arith.mulf %492, %491 : vector<1x256xf32>
      %494 = vector.extract_strided_slice %148 {offsets = [1, 0, 0], sizes = [1, 1, 256], strides = [1, 1, 1]} : vector<2x1x256xf32> to vector<1x1x256xf32>
      %495 = vector.shape_cast %494 : vector<1x1x256xf32> to vector<1x256xf32>
      %496 = vector.broadcast %102 : f32 to vector<1x256xf32>
      %497 = arith.mulf %496, %495 : vector<1x256xf32>
      %498 = arith.addf %493, %497 : vector<1x256xf32>
      %499 = arith.addf %489, %498 : vector<1x256xf32>
      %500 = vector.extract_strided_slice %154 {offsets = [0, 0, 0], sizes = [1, 1, 256], strides = [1, 1, 1]} : vector<2x1x256xf32> to vector<1x1x256xf32>
      %501 = vector.shape_cast %500 : vector<1x1x256xf32> to vector<1x256xf32>
      %502 = vector.broadcast %60 : f32 to vector<1x256xf32>
      %503 = arith.mulf %502, %501 : vector<1x256xf32>
      %504 = vector.extract_strided_slice %154 {offsets = [1, 0, 0], sizes = [1, 1, 256], strides = [1, 1, 1]} : vector<2x1x256xf32> to vector<1x1x256xf32>
      %505 = vector.shape_cast %504 : vector<1x1x256xf32> to vector<1x256xf32>
      %506 = vector.broadcast %109 : f32 to vector<1x256xf32>
      %507 = arith.mulf %506, %505 : vector<1x256xf32>
      %508 = arith.addf %503, %507 : vector<1x256xf32>
      %509 = arith.addf %499, %508 : vector<1x256xf32>
      %510 = vector.extract_strided_slice %160 {offsets = [0, 0, 0], sizes = [1, 1, 256], strides = [1, 1, 1]} : vector<2x1x256xf32> to vector<1x1x256xf32>
      %511 = vector.shape_cast %510 : vector<1x1x256xf32> to vector<1x256xf32>
      %512 = vector.broadcast %67 : f32 to vector<1x256xf32>
      %513 = arith.mulf %512, %511 : vector<1x256xf32>
      %514 = vector.extract_strided_slice %160 {offsets = [1, 0, 0], sizes = [1, 1, 256], strides = [1, 1, 1]} : vector<2x1x256xf32> to vector<1x1x256xf32>
      %515 = vector.shape_cast %514 : vector<1x1x256xf32> to vector<1x256xf32>
      %516 = vector.broadcast %116 : f32 to vector<1x256xf32>
      %517 = arith.mulf %516, %515 : vector<1x256xf32>
      %518 = arith.addf %513, %517 : vector<1x256xf32>
      %519 = arith.addf %509, %518 : vector<1x256xf32>
      %520 = vector.extract_strided_slice %166 {offsets = [0, 0, 0], sizes = [1, 1, 256], strides = [1, 1, 1]} : vector<2x1x256xf32> to vector<1x1x256xf32>
      %521 = vector.shape_cast %520 : vector<1x1x256xf32> to vector<1x256xf32>
      %522 = vector.broadcast %74 : f32 to vector<1x256xf32>
      %523 = arith.mulf %522, %521 : vector<1x256xf32>
      %524 = vector.extract_strided_slice %166 {offsets = [1, 0, 0], sizes = [1, 1, 256], strides = [1, 1, 1]} : vector<2x1x256xf32> to vector<1x1x256xf32>
      %525 = vector.shape_cast %524 : vector<1x1x256xf32> to vector<1x256xf32>
      %526 = vector.broadcast %123 : f32 to vector<1x256xf32>
      %527 = arith.mulf %526, %525 : vector<1x256xf32>
      %528 = arith.addf %523, %527 : vector<1x256xf32>
      %529 = arith.addf %519, %528 : vector<1x256xf32>
      %c255_i32 = arith.constant 255 : i32
      %530 = tpu.dynamic_rotate %529 by %c255_i32 dim 1 : vector<1x256xf32>, i32 -> vector<1x256xf32>
      %531 = vector.extract_strided_slice %27 {offsets = [4, 0], sizes = [1, 256], strides = [1, 1]} : vector<7x256xf32> to vector<1x256xf32>
      %532 = vector.shape_cast %531 : vector<1x256xf32> to vector<256xf32>
      %533 = vector.shape_cast %532 : vector<256xf32> to vector<1x256xf32>
      %534 = arith.mulf %530, %533 : vector<1x256xf32>
      %535 = arith.addf %460, %534 : vector<1x256xf32>
      %536 = vector.extract_strided_slice %131 {offsets = [0, 0, 0], sizes = [1, 1, 256], strides = [1, 1, 1]} : vector<2x1x256xf32> to vector<1x1x256xf32>
      %537 = vector.shape_cast %536 : vector<1x1x256xf32> to vector<1x256xf32>
      %538 = vector.broadcast %33 : f32 to vector<1x256xf32>
      %539 = arith.mulf %538, %537 : vector<1x256xf32>
      %540 = vector.extract_strided_slice %131 {offsets = [1, 0, 0], sizes = [1, 1, 256], strides = [1, 1, 1]} : vector<2x1x256xf32> to vector<1x1x256xf32>
      %541 = vector.shape_cast %540 : vector<1x1x256xf32> to vector<1x256xf32>
      %542 = vector.broadcast %82 : f32 to vector<1x256xf32>
      %543 = arith.mulf %542, %541 : vector<1x256xf32>
      %544 = arith.addf %539, %543 : vector<1x256xf32>
      %545 = vector.extract_strided_slice %137 {offsets = [0, 0, 0], sizes = [1, 1, 256], strides = [1, 1, 1]} : vector<2x1x256xf32> to vector<1x1x256xf32>
      %546 = vector.shape_cast %545 : vector<1x1x256xf32> to vector<1x256xf32>
      %547 = vector.broadcast %40 : f32 to vector<1x256xf32>
      %548 = arith.mulf %547, %546 : vector<1x256xf32>
      %549 = vector.extract_strided_slice %137 {offsets = [1, 0, 0], sizes = [1, 1, 256], strides = [1, 1, 1]} : vector<2x1x256xf32> to vector<1x1x256xf32>
      %550 = vector.shape_cast %549 : vector<1x1x256xf32> to vector<1x256xf32>
      %551 = vector.broadcast %89 : f32 to vector<1x256xf32>
      %552 = arith.mulf %551, %550 : vector<1x256xf32>
      %553 = arith.addf %548, %552 : vector<1x256xf32>
      %554 = arith.addf %544, %553 : vector<1x256xf32>
      %555 = vector.extract_strided_slice %143 {offsets = [0, 0, 0], sizes = [1, 1, 256], strides = [1, 1, 1]} : vector<2x1x256xf32> to vector<1x1x256xf32>
      %556 = vector.shape_cast %555 : vector<1x1x256xf32> to vector<1x256xf32>
      %557 = vector.broadcast %47 : f32 to vector<1x256xf32>
      %558 = arith.mulf %557, %556 : vector<1x256xf32>
      %559 = vector.extract_strided_slice %143 {offsets = [1, 0, 0], sizes = [1, 1, 256], strides = [1, 1, 1]} : vector<2x1x256xf32> to vector<1x1x256xf32>
      %560 = vector.shape_cast %559 : vector<1x1x256xf32> to vector<1x256xf32>
      %561 = vector.broadcast %96 : f32 to vector<1x256xf32>
      %562 = arith.mulf %561, %560 : vector<1x256xf32>
      %563 = arith.addf %558, %562 : vector<1x256xf32>
      %564 = arith.addf %554, %563 : vector<1x256xf32>
      %565 = vector.extract_strided_slice %148 {offsets = [0, 0, 0], sizes = [1, 1, 256], strides = [1, 1, 1]} : vector<2x1x256xf32> to vector<1x1x256xf32>
      %566 = vector.shape_cast %565 : vector<1x1x256xf32> to vector<1x256xf32>
      %567 = vector.broadcast %54 : f32 to vector<1x256xf32>
      %568 = arith.mulf %567, %566 : vector<1x256xf32>
      %569 = vector.extract_strided_slice %148 {offsets = [1, 0, 0], sizes = [1, 1, 256], strides = [1, 1, 1]} : vector<2x1x256xf32> to vector<1x1x256xf32>
      %570 = vector.shape_cast %569 : vector<1x1x256xf32> to vector<1x256xf32>
      %571 = vector.broadcast %103 : f32 to vector<1x256xf32>
      %572 = arith.mulf %571, %570 : vector<1x256xf32>
      %573 = arith.addf %568, %572 : vector<1x256xf32>
      %574 = arith.addf %564, %573 : vector<1x256xf32>
      %575 = vector.extract_strided_slice %154 {offsets = [0, 0, 0], sizes = [1, 1, 256], strides = [1, 1, 1]} : vector<2x1x256xf32> to vector<1x1x256xf32>
      %576 = vector.shape_cast %575 : vector<1x1x256xf32> to vector<1x256xf32>
      %577 = vector.broadcast %61 : f32 to vector<1x256xf32>
      %578 = arith.mulf %577, %576 : vector<1x256xf32>
      %579 = vector.extract_strided_slice %154 {offsets = [1, 0, 0], sizes = [1, 1, 256], strides = [1, 1, 1]} : vector<2x1x256xf32> to vector<1x1x256xf32>
      %580 = vector.shape_cast %579 : vector<1x1x256xf32> to vector<1x256xf32>
      %581 = vector.broadcast %110 : f32 to vector<1x256xf32>
      %582 = arith.mulf %581, %580 : vector<1x256xf32>
      %583 = arith.addf %578, %582 : vector<1x256xf32>
      %584 = arith.addf %574, %583 : vector<1x256xf32>
      %585 = vector.extract_strided_slice %160 {offsets = [0, 0, 0], sizes = [1, 1, 256], strides = [1, 1, 1]} : vector<2x1x256xf32> to vector<1x1x256xf32>
      %586 = vector.shape_cast %585 : vector<1x1x256xf32> to vector<1x256xf32>
      %587 = vector.broadcast %68 : f32 to vector<1x256xf32>
      %588 = arith.mulf %587, %586 : vector<1x256xf32>
      %589 = vector.extract_strided_slice %160 {offsets = [1, 0, 0], sizes = [1, 1, 256], strides = [1, 1, 1]} : vector<2x1x256xf32> to vector<1x1x256xf32>
      %590 = vector.shape_cast %589 : vector<1x1x256xf32> to vector<1x256xf32>
      %591 = vector.broadcast %117 : f32 to vector<1x256xf32>
      %592 = arith.mulf %591, %590 : vector<1x256xf32>
      %593 = arith.addf %588, %592 : vector<1x256xf32>
      %594 = arith.addf %584, %593 : vector<1x256xf32>
      %595 = vector.extract_strided_slice %166 {offsets = [0, 0, 0], sizes = [1, 1, 256], strides = [1, 1, 1]} : vector<2x1x256xf32> to vector<1x1x256xf32>
      %596 = vector.shape_cast %595 : vector<1x1x256xf32> to vector<1x256xf32>
      %597 = vector.broadcast %75 : f32 to vector<1x256xf32>
      %598 = arith.mulf %597, %596 : vector<1x256xf32>
      %599 = vector.extract_strided_slice %166 {offsets = [1, 0, 0], sizes = [1, 1, 256], strides = [1, 1, 1]} : vector<2x1x256xf32> to vector<1x1x256xf32>
      %600 = vector.shape_cast %599 : vector<1x1x256xf32> to vector<1x256xf32>
      %601 = vector.broadcast %124 : f32 to vector<1x256xf32>
      %602 = arith.mulf %601, %600 : vector<1x256xf32>
      %603 = arith.addf %598, %602 : vector<1x256xf32>
      %604 = arith.addf %594, %603 : vector<1x256xf32>
      %c254_i32 = arith.constant 254 : i32
      %605 = tpu.dynamic_rotate %604 by %c254_i32 dim 1 : vector<1x256xf32>, i32 -> vector<1x256xf32>
      %606 = vector.extract_strided_slice %27 {offsets = [5, 0], sizes = [1, 256], strides = [1, 1]} : vector<7x256xf32> to vector<1x256xf32>
      %607 = vector.shape_cast %606 : vector<1x256xf32> to vector<256xf32>
      %608 = vector.shape_cast %607 : vector<256xf32> to vector<1x256xf32>
      %609 = arith.mulf %605, %608 : vector<1x256xf32>
      %610 = arith.addf %535, %609 : vector<1x256xf32>
      %611 = vector.extract_strided_slice %131 {offsets = [0, 0, 0], sizes = [1, 1, 256], strides = [1, 1, 1]} : vector<2x1x256xf32> to vector<1x1x256xf32>
      %612 = vector.shape_cast %611 : vector<1x1x256xf32> to vector<1x256xf32>
      %613 = vector.broadcast %34 : f32 to vector<1x256xf32>
      %614 = arith.mulf %613, %612 : vector<1x256xf32>
      %615 = vector.extract_strided_slice %131 {offsets = [1, 0, 0], sizes = [1, 1, 256], strides = [1, 1, 1]} : vector<2x1x256xf32> to vector<1x1x256xf32>
      %616 = vector.shape_cast %615 : vector<1x1x256xf32> to vector<1x256xf32>
      %617 = vector.broadcast %83 : f32 to vector<1x256xf32>
      %618 = arith.mulf %617, %616 : vector<1x256xf32>
      %619 = arith.addf %614, %618 : vector<1x256xf32>
      %620 = vector.extract_strided_slice %137 {offsets = [0, 0, 0], sizes = [1, 1, 256], strides = [1, 1, 1]} : vector<2x1x256xf32> to vector<1x1x256xf32>
      %621 = vector.shape_cast %620 : vector<1x1x256xf32> to vector<1x256xf32>
      %622 = vector.broadcast %41 : f32 to vector<1x256xf32>
      %623 = arith.mulf %622, %621 : vector<1x256xf32>
      %624 = vector.extract_strided_slice %137 {offsets = [1, 0, 0], sizes = [1, 1, 256], strides = [1, 1, 1]} : vector<2x1x256xf32> to vector<1x1x256xf32>
      %625 = vector.shape_cast %624 : vector<1x1x256xf32> to vector<1x256xf32>
      %626 = vector.broadcast %90 : f32 to vector<1x256xf32>
      %627 = arith.mulf %626, %625 : vector<1x256xf32>
      %628 = arith.addf %623, %627 : vector<1x256xf32>
      %629 = arith.addf %619, %628 : vector<1x256xf32>
      %630 = vector.extract_strided_slice %143 {offsets = [0, 0, 0], sizes = [1, 1, 256], strides = [1, 1, 1]} : vector<2x1x256xf32> to vector<1x1x256xf32>
      %631 = vector.shape_cast %630 : vector<1x1x256xf32> to vector<1x256xf32>
      %632 = vector.broadcast %48 : f32 to vector<1x256xf32>
      %633 = arith.mulf %632, %631 : vector<1x256xf32>
      %634 = vector.extract_strided_slice %143 {offsets = [1, 0, 0], sizes = [1, 1, 256], strides = [1, 1, 1]} : vector<2x1x256xf32> to vector<1x1x256xf32>
      %635 = vector.shape_cast %634 : vector<1x1x256xf32> to vector<1x256xf32>
      %636 = vector.broadcast %97 : f32 to vector<1x256xf32>
      %637 = arith.mulf %636, %635 : vector<1x256xf32>
      %638 = arith.addf %633, %637 : vector<1x256xf32>
      %639 = arith.addf %629, %638 : vector<1x256xf32>
      %640 = vector.extract_strided_slice %148 {offsets = [0, 0, 0], sizes = [1, 1, 256], strides = [1, 1, 1]} : vector<2x1x256xf32> to vector<1x1x256xf32>
      %641 = vector.shape_cast %640 : vector<1x1x256xf32> to vector<1x256xf32>
      %642 = vector.broadcast %55 : f32 to vector<1x256xf32>
      %643 = arith.mulf %642, %641 : vector<1x256xf32>
      %644 = vector.extract_strided_slice %148 {offsets = [1, 0, 0], sizes = [1, 1, 256], strides = [1, 1, 1]} : vector<2x1x256xf32> to vector<1x1x256xf32>
      %645 = vector.shape_cast %644 : vector<1x1x256xf32> to vector<1x256xf32>
      %646 = vector.broadcast %104 : f32 to vector<1x256xf32>
      %647 = arith.mulf %646, %645 : vector<1x256xf32>
      %648 = arith.addf %643, %647 : vector<1x256xf32>
      %649 = arith.addf %639, %648 : vector<1x256xf32>
      %650 = vector.extract_strided_slice %154 {offsets = [0, 0, 0], sizes = [1, 1, 256], strides = [1, 1, 1]} : vector<2x1x256xf32> to vector<1x1x256xf32>
      %651 = vector.shape_cast %650 : vector<1x1x256xf32> to vector<1x256xf32>
      %652 = vector.broadcast %62 : f32 to vector<1x256xf32>
      %653 = arith.mulf %652, %651 : vector<1x256xf32>
      %654 = vector.extract_strided_slice %154 {offsets = [1, 0, 0], sizes = [1, 1, 256], strides = [1, 1, 1]} : vector<2x1x256xf32> to vector<1x1x256xf32>
      %655 = vector.shape_cast %654 : vector<1x1x256xf32> to vector<1x256xf32>
      %656 = vector.broadcast %111 : f32 to vector<1x256xf32>
      %657 = arith.mulf %656, %655 : vector<1x256xf32>
      %658 = arith.addf %653, %657 : vector<1x256xf32>
      %659 = arith.addf %649, %658 : vector<1x256xf32>
      %660 = vector.extract_strided_slice %160 {offsets = [0, 0, 0], sizes = [1, 1, 256], strides = [1, 1, 1]} : vector<2x1x256xf32> to vector<1x1x256xf32>
      %661 = vector.shape_cast %660 : vector<1x1x256xf32> to vector<1x256xf32>
      %662 = vector.broadcast %69 : f32 to vector<1x256xf32>
      %663 = arith.mulf %662, %661 : vector<1x256xf32>
      %664 = vector.extract_strided_slice %160 {offsets = [1, 0, 0], sizes = [1, 1, 256], strides = [1, 1, 1]} : vector<2x1x256xf32> to vector<1x1x256xf32>
      %665 = vector.shape_cast %664 : vector<1x1x256xf32> to vector<1x256xf32>
      %666 = vector.broadcast %118 : f32 to vector<1x256xf32>
      %667 = arith.mulf %666, %665 : vector<1x256xf32>
      %668 = arith.addf %663, %667 : vector<1x256xf32>
      %669 = arith.addf %659, %668 : vector<1x256xf32>
      %670 = vector.extract_strided_slice %166 {offsets = [0, 0, 0], sizes = [1, 1, 256], strides = [1, 1, 1]} : vector<2x1x256xf32> to vector<1x1x256xf32>
      %671 = vector.shape_cast %670 : vector<1x1x256xf32> to vector<1x256xf32>
      %672 = vector.broadcast %76 : f32 to vector<1x256xf32>
      %673 = arith.mulf %672, %671 : vector<1x256xf32>
      %674 = vector.extract_strided_slice %166 {offsets = [1, 0, 0], sizes = [1, 1, 256], strides = [1, 1, 1]} : vector<2x1x256xf32> to vector<1x1x256xf32>
      %675 = vector.shape_cast %674 : vector<1x1x256xf32> to vector<1x256xf32>
      %676 = vector.broadcast %125 : f32 to vector<1x256xf32>
      %677 = arith.mulf %676, %675 : vector<1x256xf32>
      %678 = arith.addf %673, %677 : vector<1x256xf32>
      %679 = arith.addf %669, %678 : vector<1x256xf32>
      %c253_i32 = arith.constant 253 : i32
      %680 = tpu.dynamic_rotate %679 by %c253_i32 dim 1 : vector<1x256xf32>, i32 -> vector<1x256xf32>
      %681 = vector.extract_strided_slice %27 {offsets = [6, 0], sizes = [1, 256], strides = [1, 1]} : vector<7x256xf32> to vector<1x256xf32>
      %682 = vector.shape_cast %681 : vector<1x256xf32> to vector<256xf32>
      %683 = vector.shape_cast %682 : vector<256xf32> to vector<1x256xf32>
      %684 = arith.mulf %680, %683 : vector<1x256xf32>
      %685 = arith.addf %610, %684 : vector<1x256xf32>
      %686 = arith.negf %685 : vector<1x256xf32>
      %687 = math.exp %686 : vector<1x256xf32>
      %cst_32 = arith.constant 1.000000e+00 : f32
      %688 = vector.broadcast %cst_32 : f32 to vector<1x256xf32>
      %689 = arith.addf %688, %687 : vector<1x256xf32>
      %690 = arith.divf %688, %689 : vector<1x256xf32>
      %691 = vector.shape_cast %690 : vector<1x256xf32> to vector<1x1x256xf32>
      %c0_33 = arith.constant 0 : index
      %c0_34 = arith.constant 0 : index
      %c0_35 = arith.constant 0 : index
      %692 = vector.load %arg6[%c0_33, %c0_34, %c0_35] : memref<1x1x256xf32, #tpu.memory_space<vmem>>, vector<1x1x256xf32>
      tpu.vector_store %arg6[%c0_33, %c0_34, %c0_35], %691 {strides = array<i32>} : memref<1x1x256xf32, #tpu.memory_space<vmem>>, vector<1x1x256xf32>,
    } else {
    }
    return
  }
  func.func @transform_0(%arg0: i32, %arg1: i32) -> i32 {
    %c0_i32 = arith.constant 0 : i32
    %c0_i32_0 = arith.constant 0 : i32
    return %c0_i32 : i32
  }
  func.func @transform_1(%arg0: i32, %arg1: i32) -> (i32, i32) {
    %c0_i32 = arith.constant 0 : i32
    %c0_i32_0 = arith.constant 0 : i32
    %c0_i32_1 = arith.constant 0 : i32
    return %c0_i32, %c0_i32_0 : i32, i32
  }
  func.func @transform_2(%arg0: i32, %arg1: i32) -> (i32, i32) {
    %c0_i32 = arith.constant 0 : i32
    %c0_i32_0 = arith.constant 0 : i32
    %c0_i32_1 = arith.constant 0 : i32
    return %c0_i32, %c0_i32_0 : i32, i32
  }
  func.func @transform_3(%arg0: i32, %arg1: i32) -> (i32, i32, i32) {
    %c0_i32 = arith.constant 0 : i32
    %c0_i32_0 = arith.constant 0 : i32
    return %arg0, %arg1, %c0_i32 : i32, i32, i32
  }
  func.func @transform_4(%arg0: i32, %arg1: i32) -> (i32, i32, i32) {
    %c0_i32 = arith.constant 0 : i32
    %c0_i32_0 = arith.constant 0 : i32
    %c0_i32_1 = arith.constant 0 : i32
    return %arg0, %c0_i32, %c0_i32_0 : i32, i32, i32
  }
}

</mosaic_0001>

<bundles_post_ra>
// kernel: tpu_custom_call.1
= control target key start
LH: loop header
LB: loop body
LE: loop exit
PB: predicated region body
PF: predicated region fallthrough
CT: control target
= control target key end

     0   :  { %s3070_s0 = inlined_call_operand.hbm [shape: f32[98], index: 0, kind: input, shape index: {}]   ;;  %s3071_s1 = inlined_call_operand.hbm [shape: f32[7,256], index: 1, kind: input, shape index: {}]   ;;  %s3072_s2 = inlined_call_operand.hbm [shape: f32[7,256], index: 2, kind: input, shape index: {}]   ;;  %s3073_s3 = inlined_call_operand.hbm [shape: f32[2,4,256], index: 3, kind: input, shape index: {}]   ;;  %s3074_s4 = inlined_call_operand.hbm [shape: f32[2,1,256], index: 4, kind: output, shape index: {}]  }
   0x1   :  { %3135 = sst [smem:[#allocation42_spill]] %s3070_s0 }
   0x2   :  { %3136 = sst [smem:[#allocation43_spill]] %s3071_s1 }
   0x3   :  { %3137 = sst [smem:[#allocation44_spill]] %s3072_s2 }
   0x4   :  { %3138 = sst [smem:[#allocation45_spill]] %s3073_s3 }
   0x5   :  { %3139 = sst [smem:[#allocation46_spill]] %s3074_s4 }
   0x6   :  { %9 = vsyncpa [#allocation7], 0 }
   0x7   :  { %10 = vsyncpa [#allocation5], 0 }
   0x8   :  { %11 = vsyncpa [#allocation10], 0 }
   0x9   :  { %12 = vsyncpa [#allocation6], 0 }
   0xa   :  { %14 = vsyncpa [#allocation6 + $0x1], 0  ;;  %s1794_s15 = smov 0   ;;  %s1796_s16 = smov 0  }
   0xb   :  { %s1798_s17 = smov 0   ;;  %s1800_s18 = smov 0  }
   0xc   :  { %s1802_s19 = smov 0   ;;  %s1804_s20 = smov 0  }
   0xd LB: > { %3140 = sst [smem:[#allocation18_spill]] %s1732_s15  ;;  %s1825_s21 = sadd.s32 4294967295, %s1752_s20   ;;  %s1752_s20 = sphi %s1804_s20, %s20_s20   ;;  %s1748_s19 = sphi %s1802_s19, %s3289_s19   ;;  %s1744_s18 = sphi %s1800_s18, %s3288_s18   ;;  %s1740_s17 = sphi %s1798_s17, %s3287_s17   ;;  %s1736_s16 = sphi %s1796_s16, %s3286_s16   ;;  %s1732_s15 = sphi %s1794_s15, %s3285_s15  }
   0xe   : > { %3141 = sst [smem:[#allocation19_spill]] %s1736_s16  ;;  %s1321_s22 = sadd.s32 4294967294, %s1752_s20  }
   0xf   : > { %3142 = sst [smem:[#allocation20_spill]] %s1740_s17  ;;  %p117_p0 = scmp.ne.s32.totalorder %s1736_s16, %s1732_s15 }
  0x10   : > { %3143 = sst [smem:[#allocation21_spill]] %s1744_s18  ;;  %p118_p1 = scmp.eq.s32.totalorder %s1825_s21, 0 }
  0x11   : > { %3144 = sst [smem:[#allocation22_spill]] %s1748_s19  ;;  %p141_p2 = scmp.eq.s32.totalorder %s1825_s21, 1 }
  0x12   : > { %3145 = sst [smem:[#allocation23_spill]] %s1752_s20  ;;  %p147_p3 = scmp.eq.s32.totalorder %s1321_s22, 1 }
  0x13   : > { %p1834_p4 = por %p118_p1, %p117_p0  ;;  %p1322_p5 = scmp.ge.s32.totalorder %s1752_s20, 1 }
  0x14   : > { %p1839_p6 = por %p147_p3, %p117_p0  ;;  %p154_p7 = scmp.lt.s32.totalorder %s1752_s20, 3 }
  0x15   : > { %s3149_s1 = sld [smem:[#allocation43_spill]]  ;;  %p1326_p9 = scmp.ge.s32.totalorder %s1752_s20, 2 }
  0x16   : > { %s3147_s24 = scalar_select %p1839_p6, 1, 0 }
  0x17   : > { %p1847_p8 = pnand %p1322_p5, %p154_p7  ;;  %s1754_s29 = smov [#allocation8]  }
  0x18   : > { %3148 = sst [smem:[#allocation24_spill]] %s3147_s24  ;;  %s178_s30 = sshll.u32 %s1754_s29, 4  ;;  %s179_s30 = int_to_ptr.vmem [resolvable:$true] %s178_s30 }
  0x19   : > { %p1456_p10 = pneg %p1847_p8  ;;  %s3151_s0 = sld [smem:[#allocation42_spill]] }
  0x1a   : > { %s1755_s8 = smov [#allocation4]   ;;  %s3152_s2 = sld [smem:[#allocation44_spill]] }
  0x1b   : > { %s176_s27 = sshll.u32 %s3149_s1, 4  ;;  %p1457_p11 = pnand %p1456_p10, %p118_p1  ;;  %s177_s27 = int_to_ptr.hbm [resolvable:$true] %s176_s27 }
  0x1c   : > { %s1756_s12 = smov [#allocation9]   ;;  %s32_s14 = sadd.s32 1, %s1748_s19 }
  0x1d   : > { %1462 = dma.hbm_to_vmem [thread:$0]  (!%p1457_p11), %s177_s27, 256, %s179_s30, [#allocation5]  }
  0x1e   : > { %s190_s13 = sshll.u32 %s1756_s12, 4  ;;  %p111_p12 = scmp.ne.s32.totalorder %s1740_s17, %s1736_s16  ;;  %s191_s13 = int_to_ptr.vmem [resolvable:$true] %s190_s13 }
  0x1f   : > { %s166_s7 = sshll.u32 %s3151_s0, 4  ;;  %p34_p13 = scmp.ge.s32.totalorder %s32_s14, 2  ;;  %s167_s7 = int_to_ptr.hbm [resolvable:$true] %s166_s7 }
  0x20   : > { %1459 = dma.hbm_to_smem (!%p1457_p11), %s167_s7, 16, %s1755_s8, [#allocation7]  }
  0x21   : > { %s188_s11 = sshll.u32 %s3152_s2, 4  ;;  %p112_p0 = scmp.eq.s32.totalorder %s1752_s20, 0  ;;  %s189_s11 = int_to_ptr.hbm [resolvable:$true] %s188_s11 }
  0x22   : > { %1465 = dma.hbm_to_vmem [thread:$0]  (!%p1457_p11), %s189_s11, 256, %s191_s13, [#allocation10]  }
  0x23   : > { %s104_s22 = sadd.s32 1, %s1740_s17  ;;  %p1869_p3 = por %p141_p2, %p111_p12 }
  0x24   : > { %s3291_s14 = smov (%p34_p13, %s32_s14), 0  ;;  %p1875_p5 = por %p112_p0, %p111_p12 }
  0x25   : > { %s3153_s25 = scalar_select %p1869_p3, 1, 0 }
  0x26   : > { %3155 = sst [smem:[#allocation26_spill]] %s3291_s14  ;;  %p1477_p7 = scmp.lt.s32.totalorder %s1752_s20, 2 }
  0x27   : > { %3154 = sst [smem:[#allocation25_spill]] %s3153_s25  ;;  %s99_s27 = ssub.s32 %s1748_s19, %s3291_s14 }
  0x28   : > { %s201_s29 = sand.u32 1, %s1752_s20   ;;  %p102_p10 = scmp.eq.s32.totalorder %s99_s27, 0 }
  0x29   : > { %s203_s30 = sand.u32 1, %s1740_s17   ;;  %s1439_s6 = sshll.u32 %s1748_s19, 3 }
  0x2a   : > { %s1327_s5 = sshll.u32 %s203_s30, 3  ;;  %s3158_s3 = sld [smem:[#allocation45_spill]] }
  0x2b   : > { %s1886_s7 = scalar_select %p102_p10, %s1740_s17, %s104_s22  }
  0x2c   : > { %s205_s12 = scalar_lea.vmem [#allocation11], %s1327_s5  ;;  %p1467_p2 = pnand %p1477_p7, %p1875_p5 }
  0x2d   : > { %3157 = sst [smem:[#allocation27_spill]] %s1886_s7  ;;  %s216_s13 = sshll.u32 %s205_s12, 4  ;;  %s217_s13 = int_to_ptr.vmem [resolvable:$true] %s216_s13 }
  0x2e   : > { %s202_s0 = scalar_lea.sflag [#allocation5], %s201_s29  ;;  %225 = sbr.rel (%p1847_p8) target bundleno = 492 (0x1ec), region = 36 }
  0x30   : > { %s212_s10 = scalar_lea.hbm %s3158_s3, %s1439_s6 }
  0x31   : > { %s214_s11 = sshll.u32 %s212_s10, 4  ;;  %s215_s11 = int_to_ptr.hbm [resolvable:$true] %s214_s11 }
  0x32   : > { %1469 = dma.hbm_to_vmem [thread:$0]  (!%p1467_p2), %s215_s11, 128, %s217_s13, %s202_s0  }
  0x33   : > { %1711 = dma.done.wait (%p118_p1), [#allocation7], 16  }
  0x34   : > { %1713 = vsyncadd (%p118_p1), [#allocation7], 4294967280 }
  0x35   : > { %1715 = dma.done.wait (%p118_p1), [#allocation5], 256  }
  0x36   : > { %1717 = vsyncadd (%p118_p1), [#allocation5], 4294967040 }
  0x37   : > { %1719 = dma.done.wait (%p118_p1), [#allocation10], 256  }
  0x38   : > { %1721 = vsyncadd (%p118_p1), [#allocation10], 4294967040  ;;  %s242_s0 = sand.u32 1, %s1825_s21   ;;  %s1911_s28 = sand.u32 1, %s1736_s16  }
  0x39   : > { %3159 = sst [smem:[#allocation28_spill]] %s1911_s28  ;;  %s1334_s22 = sshll.u32 %s1911_s28, 3 }
  0x3a   : > { %s243_s26 = scalar_lea.sflag [#allocation5], %s242_s0  ;;  %s246_s27 = scalar_lea.vmem [#allocation11], %s1334_s22 }
  0x3b   : > { %1723 = dma.done.wait (%p1834_p4), %s243_s26, 128  }
  0x3c   : > { %1725 = vsyncadd (%p1834_p4), %s243_s26, 4294967168 }
  0x3d   : > { %252 = sfence }
  0x3e   : > { %v281_v0 = vld [vmem:[%s246_s27] sm:$0xff]  ;;  %vm292_vm0 = vcmask 1043456   ;;  %s1757_s21 = smov 48   ;;  %s1758_s23 = smov 32   ;;  %v3096_v36 = vlaneseq }
  0x3f   : > { %287 = vst [vmem:[#allocation1] ss:$2 sm:$0xff] %v281_v0  ;;  %s1759_s29 = smov 16   ;;  %s1760_s30 = smov 112   ;;  %v1980_v37 = vld [vmem:[#allocation8] sm:$0x7f] }
  0x40   : > { %s1761_s5 = smov 96   ;;  %s1762_s6 = smov 80   ;;  %v1982_v38 = vld [vmem:[#allocation8 + $0x8] sm:$0x7f]  ;;  %v1987_v39 = vand.u32 127, %v3096_v36  ;;  %v508_v40 = vrot.slane %v1980_v37, 3 }
  0x41   : > { %s1938_s8 = sld [smem:[#allocation4]]  ;;  %v509_v41 = vrot.slane %v1982_v38, 3  ;;  %v3106_v49 = vrot.slane %v1980_v37, 2  ;;  %v3105_v50 = vrot.slane %v1982_v38, 2  ;;  %v3108_v51 = vrot.slane %v1980_v37, 1 }
  0x42   : > { %s1940_s9 = sld [smem:[#allocation4 + $0x1]]  ;;  %vm455_vm1 = vcmp.lt.s32.totalorder %v1987_v39, 48  ;;  %v3107_v53 = vrot.slane %v1982_v38, 1  ;;  %vm495_vm2 = vcmp.lt.s32.totalorder %v1987_v39, 16  ;;  %vm472_vm3 = vcmp.lt.s32.totalorder %v1987_v39, 32 }
  0x43   : > { %s1942_s10 = sld [smem:[#allocation4 + $0x2]]  ;;  %vm524_vm4 = vcmp.lt.s32.totalorder %v1987_v39, 112  ;;  %vm545_vm5 = vcmp.lt.s32.totalorder %v1987_v39, 96  ;;  %vm566_vm6 = vcmp.lt.s32.totalorder %v1987_v39, 80  ;;  %vm728_vm7 = vcmp.lt.s32.totalorder %v1987_v39, 2 }
  0x44   : > { %s1944_s11 = sld [smem:[#allocation4 + $0x7]]  ;;  %vm651_vm8 = vcmp.lt.s32.totalorder %v1987_v39, 3  ;;  %vm813_vm9 = vcmp.lt.s32.totalorder %v1987_v39, 1  ;;  %vm966_vm10 = vcmp.lt.s32.totalorder %v1987_v39, 127  ;;  %vm1132_vm11 = vcmp.lt.s32.totalorder %v1987_v39, 125 }
  0x45   : > { %s1946_s12 = sld [smem:[#allocation4 + $0xe]]  ;;  %vm1049_vm12 = vcmp.lt.s32.totalorder %v1987_v39, 126 }
  0x46   : > { %v289_v1 = vld.sshfl [vmem:[#allocation1 + $0x8] sm:$0xff pattern:$0x75316420]  ;;  %v288_v2 = vld.sshfl [vmem:[#allocation1] sm:$0xff pattern:$0x75316420] }
  0x47   : > { %v294_v3 = vsel %vm292_vm0, %v289_v1, 0.0  ;;  %v293_v4 = vsel %vm292_vm0, %v288_v2, 0.0  ;;  %297 = vst [vmem:[#allocation1] ss:$2 sm:$0xff] %v281_v0  ;;  %s1948_s13 = sld [smem:[#allocation4 + $0x8]]  ;;  %v579_v47 = vstv %s1938_s8 }
  0x48   : > { %v321_v5 = vrot.slane %v294_v3, 4  ;;  %v315_v6 = vrot.slane %v293_v4, 4  ;;  %s1950_s0 = sld [smem:[#allocation4 + $0xf]]  ;;  %v656_v48 = vstv %s1940_s9 }
  0x49   : > { %s1952_s22 = sld [smem:[#allocation4 + $0x9]]  ;;  %v741_v52 = vstv %s1942_s10 }
  0x4a   : > { %v322_v7 = vadd.f32 %v321_v5, %v294_v3  ;;  %v316_v8 = vadd.f32 %v315_v6, %v293_v4  ;;  %s1954_s26 = sld [smem:[#allocation4 + $0x10]]  ;;  %v587_v54 = vstv %s1944_s11 }
  0x4b   : > { %s1956_s27 = sld [smem:[#allocation4 + $0x4]]  ;;  %v597_v55 = vstv %s1946_s12 }
  0x4c   : > { %v323_v9 = vrot.slane %v322_v7, 2  ;;  %v317_v10 = vrot.slane %v316_v8, 2  ;;  %s1972_s1 = sld [smem:[#allocation4 + $0x38]] }
  0x4d   : > { %s1974_s2 = sld [smem:[#allocation4 + $0x3f]]  ;;  %v664_v56 = vstv %s1948_s13 }
  0x4e   : > { %v324_v11 = vadd.f32 %v323_v9, %v322_v7  ;;  %v318_v12 = vadd.f32 %v317_v10, %v316_v8  ;;  %v299_v13 = vld.sshfl [vmem:[#allocation1 + $0x8] sm:$0xff pattern:$0x75316420]  ;;  %v298_v14 = vld.sshfl [vmem:[#allocation1] sm:$0xff pattern:$0x75316420]  ;;  %v674_v57 = vstv %s1950_s0 }
  0x4f   : > { %v303_v15 = vsel %vm292_vm0, %v299_v13, -inf  ;;  %v302_v16 = vsel %vm292_vm0, %v298_v14, -inf  ;;  %s1976_s3 = sld [smem:[#allocation4 + $0x39]]  ;;  %v749_v58 = vstv %s1952_s22 }
  0x50   : > { %v325_v17 = vrot.slane %v324_v11, 1  ;;  %v319_v18 = vrot.slane %v318_v12, 1  ;;  %v337_v19 = vrot.slane %v303_v15, 4  ;;  %v331_v20 = vrot.slane %v302_v16, 4  ;;  %s1978_s14 = sld [smem:[#allocation4 + $0x40]] }
  0x51   : > { %3160 = sst [smem:[#allocation29_spill]] %s1956_s27  ;;  %v759_v59 = vstv %s1954_s26  ;;  %v3098_v60 = vstv %s1956_s27 }
  0x52   : > { %v326_v21 = vadd.f32 %v325_v17, %v324_v11  ;;  %v320_v22 = vadd.f32 %v319_v18, %v318_v12  ;;  %v338_v23 = vmax.f32 %v303_v15, %v337_v19  ;;  %v332_v24 = vmax.f32 %v302_v16, %v331_v20  ;;  %s1984_s19 = sld [smem:[#allocation4 + $0x15]] }
  0x53   : > { %3163 = sst [smem:[#allocation32_spill]] %s1974_s2 }
  0x54   : > { %v1922_v25 = vmul.f32 0.25, %v326_v21  ;;  %v1924_v26 = vmul.f32 0.25, %v320_v22  ;;  %v339_v27 = vrot.slane %v338_v23, 2  ;;  %v333_v28 = vrot.slane %v332_v24, 2  ;;  %s1991_s7 = sld [smem:[#allocation4 + $0x46]] }
  0x55   : > { %s1993_s17 = sld [smem:[#allocation4 + $0x16]] }
  0x56   : > { %449 = vrot.lane.b32.xlu1 %v1922_v25, %s1757_s21  ;;  %445 = vrot.lane.b32.xlu0 %v1924_v26, %s1757_s21  ;;  %v340_v29 = vmax.f32 %v338_v23, %v339_v27  ;;  %v334_v30 = vmax.f32 %v332_v24, %v333_v28  ;;  %s1995_s16 = sld [smem:[#allocation4 + $0x47]]  ;;  %v2001_v42 = vmul.f32 %v509_v41, %v1922_v25 }
  0x57   : > { %464 = vrot.lane.b32.xlu2 %v1924_v26, %s1758_s23  ;;  %s1997_s20 = sld [smem:[#allocation4 + $0x1c]]  ;;  %v2010_v45 = vmul.f32 %v508_v40, %v1924_v26 }
  0x58   : > { %v341_v31 = vrot.slane %v340_v29, 1  ;;  %v335_v32 = vrot.slane %v334_v30, 1  ;;  %3164 = vst [vmem:[#allocation33_spill] sm:$0xff] %v2001_v42  ;;  %s2005_s24 = sld [smem:[#allocation4 + $0x3a]]  ;;  %v607_v5 = vstv %s1984_s19 }
  0x59   : > { %s2015_s15 = sld [smem:[#allocation4 + $0x1d]]  ;;  %v609_v11 = vmul.f32 %v607_v5, %v2001_v42  ;;  %v608_v22 = vmul.f32 %v607_v5, %v2010_v45 }
  0x5a   : > { %v342_v33 = vmax.f32 %v340_v29, %v341_v31  ;;  %v336_v34 = vmax.f32 %v334_v30, %v335_v32  ;;  %s2021_s25 = sld [smem:[#allocation4 + $0x41]]  ;;  %v610_v6 = vstv %s1991_s7 }
  0x5b   : > { %s2028_s4 = sld [smem:[#allocation4 + $0x35]]  ;;  %v684_v7 = vstv %s1993_s17 }
  0x5c   : > { %v2003_v43 = vmul.f32 %v508_v40, %v336_v34  ;;  %v2007_v44 = vmul.f32 %v509_v41, %v342_v33  ;;  %s2031_s18 = sld [smem:[#allocation4 + $0x17]]  ;;  %v687_v8 = vstv %s1995_s16  ;;  %v685_v18 = vmul.f32 %v684_v7, %v2010_v45 }
  0x5d   : > { %s2038_s28 = sld [smem:[#allocation4 + $0x48]] }
  0x5e   : > { %491 = vrot.lane.b32.xlu1 %v1922_v25, %s1759_s29  ;;  %468 = vrot.lane.b32.xlu0 %v1922_v25, %s1758_s23  ;;  %3165 = sst [smem:[#allocation34_spill]] %s2005_s24  ;;  %v612_v17 = vmul.f32 %v610_v6, %v2007_v44  ;;  %v688_v21 = vmul.f32 %v687_v8, %v2003_v43 }
  0x5f   : > { %487 = vrot.lane.b32.xlu2 %v1924_v26, %s1759_s29  ;;  %3166 = sst [smem:[#allocation35_spill]] %s2015_s15 }
  0x60   : > { %s2058_s2 = sld [smem:[#allocation4 + $0x36]]  ;;  %v2089_v29 = vadd.f32 %v612_v17, %v609_v11  ;;  %v2107_v41 = vadd.f32 %v688_v21, %v685_v18 }
  0x61   : > { %s2083_s19 = sld [smem:[#allocation4 + $0x19]]  ;;  %v3110_v27 = vstv %s2028_s4 }
  0x62   : > { %s2087_s7 = sld [smem:[#allocation4 + $0x4d]] }
  0x63   : > { %s2098_s24 = sld [smem:[#allocation4 + $0x4e]]  ;;  %v772_v40 = vstv %s2038_s28 }
  0x64   : > { %s2116_s15 = sld [smem:[#allocation4 + $0x4f]]  ;;  %v773_v11 = vmul.f32 %v772_v40, %v2003_v43 }
  0x65   : > { %s2138_s28 = sld [smem:[#allocation4 + $0x3c]] }
  0x66   : > { %451 = vrot.lane.b32.xlu1 %v342_v33, %s1757_s21  ;;  %447 = vrot.lane.b32.xlu0 %v336_v34, %s1757_s21  ;;  %s1958_s21 = sld [smem:[#allocation4 + $0x31]] }
  0x67   : > { %466 = vrot.lane.b32.xlu2 %v336_v34, %s1758_s23  ;;  %3167 = sst [smem:[#allocation36_spill]] %s2058_s2 }
  0x68   : > { %s2163_s8 = sld [smem:[#allocation4 + $0x43]] }
  0x69   : > { %s2181_s9 = sld [smem:[#allocation4 + $0x23]] }
  0x6a   : > { %s2184_s10 = sld [smem:[#allocation4 + $0x54]] }
  0x6b   : > { %s2206_s27 = sld [smem:[#allocation4 + $0x55]] }
  0x6c   : > { %v582_v61 = vstv %s1958_s21  ;;  %s2229_s2 = sld [smem:[#allocation4 + $0x25]] }
  0x6d   : > { %s2242_s11 = sld [smem:[#allocation4 + $0x56]] }
  0x6e   : > { %470 = vrot.lane.b32.xlu1 %v342_v33, %s1758_s23  ;;  %489 = vrot.lane.b32.xlu0 %v336_v34, %s1759_s29  ;;  %s1960_s23 = sld [smem:[#allocation4 + $0x32]] }
  0x6f   : > { %493 = vrot.lane.b32.xlu2 %v342_v33, %s1759_s29  ;;  %s1962_s29 = sld [smem:[#allocation4 + $0x33]] }
  0x70   : > { %s2272_s12 = sld [smem:[#allocation4 + $0x4a]] }
  0x71   : > { %s2283_s17 = sld [smem:[#allocation4 + $0x2a]] }
  0x72   : > { %s2297_s16 = sld [smem:[#allocation4 + $0x5b]] }
  0x73   : > { %s2305_s0 = sld [smem:[#allocation4 + $0x2b]] }
  0x74   : > { %3161 = sst [smem:[#allocation30_spill]] %s1960_s23  ;;  %v659_v62 = vstv %s1960_s23 }
  0x75   : > { %v744_v63 = vstv %s1962_s29  ;;  %s2052_s23 = sld [smem:[#allocation4 + $0x1e]] }
  0x76   : > { %518 = vrot.lane.b32.xlu1 %v336_v34, %s1760_s30  ;;  %516 = vrot.lane.b32.xlu0 %v1924_v26, %s1760_s30  ;;  %s2329_s22 = sld [smem:[#allocation4 + $0x5c]] }
  0x77   : > { %520 = vrot.lane.b32.xlu2 %v1922_v25, %s1760_s30  ;;  %s2341_s26 = sld [smem:[#allocation4 + $0x2c]] }
  0x78   : > { %s3174_s21 = sld [smem:[#allocation32_spill]] }
  0x79   : > { %s3176_s29 = sld [smem:[#allocation34_spill]] }
  0x7a   : > { %s2401_s13 = sld [smem:[#allocation4 + $0x5d]] }
  0x7e   : > { %537 = vrot.lane.b32.xlu1 %v1924_v26, %s1761_s5  ;;  %522 = vrot.lane.b32.xlu0 %v342_v33, %s1760_s30  ;;  %s1964_s30 = sld [smem:[#allocation4 + $0xb]] }
  0x7f   : > { %539 = vrot.lane.b32.xlu2 %v336_v34, %s1761_s5 }
  0x84   : > { %v3103_v13 = vstv %s1964_s30 }
  0x86   : > { %543 = vrot.lane.b32.xlu1 %v342_v33, %s1761_s5  ;;  %541 = vrot.lane.b32.xlu0 %v1922_v25, %s1761_s5  ;;  %s1966_s5 = sld [smem:[#allocation4 + $0x12]] }
  0x87   : > { %558 = vrot.lane.b32.xlu2 %v1924_v26, %s1762_s6 }
  0x8c   : > { %v3104_v14 = vstv %s1966_s5 }
  0x8e   : > { %562 = vrot.lane.b32.xlu1 %v1922_v25, %s1762_s6  ;;  %560 = vrot.lane.b32.xlu0 %v336_v34, %s1762_s6  ;;  %v611_v25 = vmul.f32 %v610_v6, %v2003_v43  ;;  %v769_v34 = vstv %s2031_s18  ;;  %s2131_s18 = sld [smem:[#allocation4 + $0x20]] }
  0x8f   : > { %564 = vrot.lane.b32.xlu2 %v342_v33, %s1762_s6  ;;  %s1968_s6 = sld [smem:[#allocation4 + $0x5]] }
  0x90   : > { %v2114_v6 = vadd.f32 %v611_v25, %v608_v22 }
  0x95   : > { %3162 = sst [smem:[#allocation31_spill]] %s1968_s6  ;;  %v3097_v0 = vstv %s1968_s6 }
  0x96   : > { %s2202_s6 = sld [smem:[#allocation4 + $0x24]] }
  0xb1   : > { %v1970_v35 = vpop.permute.xlu2 %464 }
  0xb9   : > { %v2012_v46 = vpop.permute.xlu2 %487 }
  0xc1   : > { %v2078_v23 = vpop.permute.xlu2 %466 }
  0xc8   : > { %v450_v9 = vpop.permute.xlu1 %449  ;;  %v446_v10 = vpop.permute.xlu0 %445 }
  0xc9   : > { %v456_v15 = vsel %vm455_vm1, %v446_v10, %v450_v9  ;;  %v458_v16 = vsel %vm455_vm1, %v450_v9, %v446_v10  ;;  %v770_v10 = vmul.f32 %v769_v34, %v2010_v45 }
  0xca   : > { %v2069_v19 = vmul.f32 %v458_v16, %v1980_v37  ;;  %v2072_v20 = vmul.f32 %v456_v15, %v1982_v38 }
  0xcc   : > { %3168 = vst [vmem:[#allocation37_spill] sm:$0xff] %v2069_v19  ;;  %v2096_v32 = vmul.f32 %v579_v47, %v2072_v20  ;;  %v2103_v33 = vmul.f32 %v656_v48, %v2069_v19  ;;  %v2112_v5 = vmul.f32 %v579_v47, %v2069_v19  ;;  %v2121_v9 = vmul.f32 %v741_v52, %v2069_v19 }
  0xcd   : > { %3169 = vst [vmem:[#allocation38_spill] sm:$0xff] %v2072_v20  ;;  %v2129_v16 = vmul.f32 %v741_v52, %v2072_v20  ;;  %v2136_v18 = vmul.f32 %v656_v48, %v2072_v20  ;;  %v2143_v21 = vmul.f32 %v3098_v60, %v2072_v20  ;;  %v2148_v22 = vmul.f32 %v3097_v0, %v2069_v19 }
  0xd0   : > { %v492_v47 = vpop.permute.xlu1 %491  ;;  %v469_v17 = vpop.permute.xlu0 %468 }
  0xd1   : > { %v496_v25 = vsel %vm495_vm2, %v2012_v46, %v492_v47  ;;  %v498_v48 = vsel %vm495_vm2, %v492_v47, %v2012_v46  ;;  %v473_v36 = vsel %vm472_vm3, %v1970_v35, %v469_v17  ;;  %v475_v0 = vsel %vm472_vm3, %v469_v17, %v1970_v35 }
  0xd2   : > { %v2167_v60 = vmul.f32 %v3106_v49, %v498_v48  ;;  %v2171_v52 = vmul.f32 %v3105_v50, %v496_v25  ;;  %v2175_v46 = vmul.f32 %v3108_v51, %v475_v0  ;;  %v2179_v47 = vmul.f32 %v3107_v53, %v473_v36 }
  0xd3   : > { %v2186_v17 = vadd.f32 %v773_v11, %v770_v10  ;;  %v771_v0 = vmul.f32 %v769_v34, %v2001_v42  ;;  %v774_v25 = vmul.f32 %v772_v40, %v2007_v44  ;;  %v2204_v34 = vpop.permute.xlu2 %493  ;;  %v3181_v49 = vstv %s3174_s21  ;;  %s2719_s21 = sld [smem:[#allocation4 + $0x60]] }
  0xd4   : > { %3170 = vst [vmem:[#allocation39_spill] sm:$0xff] %v2171_v52  ;;  %v2194_v48 = vmul.f32 %v587_v54, %v2179_v47  ;;  %v2199_v35 = vmul.f32 %v597_v55, %v2171_v52  ;;  %v2211_v40 = vmul.f32 %v664_v56, %v2175_v46  ;;  %v2216_v11 = vmul.f32 %v674_v57, %v2167_v60 }
  0xd5   : > { %3171 = vst [vmem:[#allocation40_spill] sm:$0xff] %v2179_v47  ;;  %v2222_v10 = vmul.f32 %v587_v54, %v2175_v46  ;;  %v2227_v15 = vmul.f32 %v597_v55, %v2167_v60  ;;  %v2234_v31 = vmul.f32 %v749_v58, %v2175_v46  ;;  %v2239_v30 = vmul.f32 %v759_v59, %v2167_v60 }
  0xd6   : > { %v2247_v54 = vmul.f32 %v749_v58, %v2179_v47  ;;  %v2252_v55 = vmul.f32 %v759_v59, %v2171_v52  ;;  %v2254_v28 = vadd.f32 %v774_v25, %v771_v0  ;;  %v2259_v24 = vmul.f32 %v664_v56, %v2179_v47 }
  0xd7   : > { %v2264_v12 = vmul.f32 %v674_v57, %v2171_v52  ;;  %v686_v58 = vmul.f32 %v684_v7, %v2001_v42  ;;  %v689_v59 = vmul.f32 %v687_v8, %v2007_v44  ;;  %v2277_v56 = vmul.f32 %v3103_v13, %v2179_v47 }
  0xd8   : > { %v452_v36 = vpop.permute.xlu1 %451  ;;  %v448_v26 = vpop.permute.xlu0 %447  ;;  %v2289_v8 = vmul.f32 %v3104_v14, %v2171_v52  ;;  %v717_v52 = vstv %s2329_s22  ;;  %s2703_s22 = sld [smem:[#allocation4 + $0x2f]] }
  0xd9   : > { %v457_v0 = vsel %vm455_vm1, %v448_v26, %v452_v36  ;;  %v459_v57 = vsel %vm455_vm1, %v452_v36, %v448_v26  ;;  %v3109_v36 = vstv %s2083_s19  ;;  %v2333_v2 = vadd.f32 %v689_v59, %v686_v58 }
  0xda   : > { %v2292_v25 = vmul.f32 %v459_v57, %v1980_v37  ;;  %v2295_v13 = vmul.f32 %v457_v0, %v1982_v38  ;;  %v3175_v59 = vrot.slane %v1980_v37, 1 }
  0xdb   : > { %v521_v50 = vpop.permute.xlu2 %520 }
  0xdc   : > { %3173 = vst [vmem:[#allocation41_spill] sm:$0xff] %v2295_v13  ;;  %v584_v57 = vmul.f32 %v582_v61, %v2295_v13  ;;  %v660_v0 = vmul.f32 %v659_v62, %v2292_v25  ;;  %v583_v26 = vmul.f32 %v582_v61, %v2292_v25  ;;  %v745_v4 = vmul.f32 %v744_v63, %v2292_v25 }
  0xdd   : > { %v746_v7 = vmul.f32 %v744_v63, %v2295_v13  ;;  %v661_v14 = vmul.f32 %v659_v62, %v2295_v13 }
  0xde   : > { %v586_v3 = vadd.f32 %v584_v57, %v2096_v32  ;;  %v662_v61 = vadd.f32 %v660_v0, %v2103_v33  ;;  %v585_v1 = vadd.f32 %v583_v26, %v2112_v5  ;;  %v747_v63 = vadd.f32 %v745_v4, %v2121_v9 }
  0xdf   : > { %v2339_v53 = vadd.f32 %v746_v7, %v2129_v16  ;;  %v2344_v33 = vadd.f32 %v661_v14, %v2136_v18  ;;  %v2349_v4 = vmul.f32 %v3110_v27, %v2295_v13  ;;  %v2354_v5 = vmul.f32 %v3109_v36, %v2001_v42 }
  0xe0   : > { %v471_v51 = vpop.permute.xlu1 %470  ;;  %v490_v32 = vpop.permute.xlu0 %489  ;;  %v3177_v26 = vrot.slane %v1982_v38, 1  ;;  %v3179_v0 = vrot.slane %v1982_v38, 2  ;;  %v3186_v27 = vstv %s3176_s29 }
  0xe1   : > { %v474_v16 = vsel %vm472_vm3, %v2078_v23, %v471_v51  ;;  %v476_v14 = vsel %vm472_vm3, %v471_v51, %v2078_v23  ;;  %v497_v18 = vsel %vm495_vm2, %v490_v32, %v2204_v34  ;;  %v499_v58 = vsel %vm495_vm2, %v2204_v34, %v490_v32 }
  0xe2   : > { %v2371_v7 = vmul.f32 %v3175_v59, %v476_v14  ;;  %v2375_v57 = vmul.f32 %v3177_v26, %v474_v16  ;;  %v3178_v51 = vrot.slane %v1980_v37, 2  ;;  %v2383_v36 = vmul.f32 %v3179_v0, %v497_v18 }
  0xe3   : > { %v3180_v14 = vstv %s1972_s1  ;;  %v3182_v26 = vstv %s1976_s3  ;;  %v3185_v32 = vmov %v3181_v49  ;;  %s3188_s1 = sld [smem:[#allocation35_spill]] }
  0xe4   : > { %v2379_v23 = vmul.f32 %v3178_v51, %v499_v58  ;;  %v592_v59 = vmul.f32 %v3180_v14, %v2375_v57  ;;  %v602_v16 = vmul.f32 %v3181_v49, %v2383_v36  ;;  %v668_v9 = vmul.f32 %v3182_v26, %v2371_v7 }
  0xe5   : > { %v3183_v58 = vstv %s1978_s14  ;;  %v3184_v18 = vmov %v3180_v14  ;;  %v753_v14 = vmul.f32 %v3186_v27, %v2371_v7  ;;  %v3187_v49 = vstv %s2021_s25 }
  0xe6   : > { %v678_v51 = vmul.f32 %v3183_v58, %v2379_v23  ;;  %v591_v0 = vmul.f32 %v3184_v18, %v2371_v7  ;;  %v601_v34 = vmul.f32 %v3185_v32, %v2379_v23  ;;  %v763_v62 = vmul.f32 %v3187_v49, %v2379_v23 }
  0xe7   : > { %v594_v26 = vadd.f32 %v592_v59, %v2194_v48  ;;  %v604_v42 = vadd.f32 %v602_v16, %v2199_v35  ;;  %v670_v58 = vadd.f32 %v668_v9, %v2211_v40  ;;  %v755_v20 = vadd.f32 %v753_v14, %v2234_v31 }
  0xe8   : > { %v680_v47 = vadd.f32 %v678_v51, %v2216_v11  ;;  %v593_v18 = vadd.f32 %v591_v0, %v2222_v10  ;;  %v603_v32 = vadd.f32 %v601_v34, %v2227_v15  ;;  %v519_v13 = vpop.permute.xlu1 %518  ;;  %v517_v27 = vpop.permute.xlu0 %516  ;;  %v765_v48 = vadd.f32 %v763_v62, %v2239_v30 }
  0xe9   : > { %v596_v19 = vadd.f32 %v594_v26, %v586_v3  ;;  %v672_v49 = vadd.f32 %v670_v58, %v662_v61  ;;  %v799_v35 = vstv %s2341_s26  ;;  %v525_v40 = vsel %vm524_vm4, %v517_v27, %v521_v50  ;;  %v2437_v62 = vpop.permute.xlu2 %539  ;;  %s2710_s26 = sld [smem:[#allocation4 + $0x59]] }
  0xea   : > { %v527_v10 = vsel %vm524_vm4, %v521_v50, %v517_v27  ;;  %v595_v15 = vadd.f32 %v593_v18, %v585_v1  ;;  %v757_v31 = vadd.f32 %v755_v20, %v747_v63  ;;  %v3189_v11 = vrot.slane %v1980_v37, 4 }
  0xeb   : > { %v3190_v61 = vrot.slane %v1982_v38, 4  ;;  %v606_v9 = vadd.f32 %v604_v42, %v596_v19  ;;  %v682_v34 = vadd.f32 %v680_v47, %v672_v49  ;;  %v3191_v1 = vstv %s3176_s29  ;;  %s2746_s29 = sld [smem:[#allocation4 + $0x6]] }
  0xec   : > { %v2431_v3 = vmul.f32 %v3189_v11, %v525_v40  ;;  %v605_v59 = vadd.f32 %v603_v32, %v595_v15  ;;  %v767_v50 = vadd.f32 %v765_v48, %v757_v31  ;;  %v754_v20 = vmul.f32 %v3191_v1, %v2375_v57 }
  0xed   : > { %v2435_v30 = vmul.f32 %v3190_v61, %v527_v10  ;;  %v3192_v63 = vstv %s2021_s25  ;;  %v616_v51 = vadd.f32 %v2089_v29, %v606_v9  ;;  %v3193_v0 = vstv %s1997_s20  ;;  %s2599_s20 = sld [smem:[#allocation4 + $0x27]] }
  0xee   : > { %v764_v16 = vmul.f32 %v3192_v63, %v2383_v36  ;;  %v692_v42 = vadd.f32 %v2107_v41, %v682_v34  ;;  %v802_v19 = vstv %s2401_s13  ;;  %v3194_v47 = vstv %s3188_s1  ;;  %s2640_s25 = sld [smem:[#allocation4 + $0x2e]]  ;;  %s1765_s1 = smov 1  }
  0xef   : > { %v619_v14 = vmul.f32 %v3193_v0, %v2435_v30  ;;  %v695_v26 = vmul.f32 %v3194_v47, %v2431_v3  ;;  %v615_v58 = vadd.f32 %v2114_v6, %v605_v59  ;;  %v3195_v18 = vmov %v3193_v0  ;;  %3242 = sst [smem:[#allocation34_spill]] %s2710_s26 }
  0xf0   : > { %v618_v32 = vmul.f32 %v3195_v18, %v2431_v3  ;;  %v777_v27 = vadd.f32 %v2186_v17, %v767_v50  ;;  %v3196_v29 = vstv %s2052_s23  ;;  %v756_v41 = vadd.f32 %v754_v20, %v2247_v54  ;;  %v538_v59 = vpop.permute.xlu1 %537  ;;  %v523_v50 = vpop.permute.xlu0 %522  ;;  %s2659_s23 = sld [smem:[#allocation4 + $0x21]] }
  0xf1   : > { %v780_v49 = vmul.f32 %v3196_v29, %v2431_v3  ;;  %v766_v48 = vadd.f32 %v764_v16, %v2252_v55  ;;  %v3197_v40 = vstv %s1976_s3  ;;  %v3198_v6 = vmov %v3196_v29  ;;  %s2535_s3 = sld [smem:[#allocation4 + $0x51]] }
  0xf2   : > { %v669_v10 = vmul.f32 %v3197_v40, %v2375_v57  ;;  %v781_v15 = vmul.f32 %v3198_v6, %v2435_v30  ;;  %v3199_v31 = vstv %s1978_s14  ;;  %v3200_v17 = vmov %v3194_v47  ;;  %s2622_s14 = sld [smem:[#allocation4 + $0x1a]] }
  0xf3   : > { %v679_v11 = vmul.f32 %v3199_v31, %v2383_v36  ;;  %v696_v61 = vmul.f32 %v3200_v17, %v2435_v30  ;;  %v3201_v9 = vstv %s2138_s28  ;;  %v758_v54 = vadd.f32 %v756_v41, %v2339_v53  ;;  %s2753_s13 = sld [smem:[#allocation4 + $0xd]] }
  0xf4   : > { %v907_v34 = vmul.f32 %v3201_v9, %v2375_v57  ;;  %v671_v55 = vadd.f32 %v669_v10, %v2259_v24  ;;  %v3202_v1 = vstv %s2163_s8  ;;  %v3203_v63 = vstv %s2272_s12 }
  0xf5   : > { %v917_v20 = vmul.f32 %v3202_v1, %v2383_v36  ;;  %v927_v16 = vmul.f32 %v3203_v63, %v2007_v44  ;;  %v526_v0 = vsel %vm524_vm4, %v519_v13, %v523_v50  ;;  %v528_v47 = vsel %vm524_vm4, %v523_v50, %v519_v13 }
  0xf6   : > { %v901_v53 = vadd.f32 %v2349_v4, %v2143_v21  ;;  %v909_v24 = vadd.f32 %v907_v34, %v2277_v56  ;;  %v3204_v18 = vrot.slane %v1980_v37, 4  ;;  %v3205_v41 = vrot.slane %v1982_v38, 4  ;;  %v2507_v4 = vpop.permute.xlu2 %558 }
  0xf7   : > { %v768_v10 = vadd.f32 %v766_v48, %v758_v54  ;;  %v673_v6 = vadd.f32 %v671_v55, %v2344_v33  ;;  %v681_v13 = vadd.f32 %v679_v11, %v2264_v12  ;;  %v919_v21 = vadd.f32 %v917_v20, %v2289_v8 }
  0xf8   : > { %v2497_v29 = vmul.f32 %v3204_v18, %v526_v0  ;;  %v2501_v40 = vmul.f32 %v3205_v41, %v528_v47  ;;  %v911_v31 = vadd.f32 %v909_v24, %v901_v53  ;;  %v929_v56 = vadd.f32 %v927_v16, %v2354_v5 }
  0xf9   : > { %v3206_v17 = vstv %s2087_s7  ;;  %v3207_v34 = vstv %s2098_s24  ;;  %v3209_v33 = vstv %s2116_s15  ;;  %v683_v8 = vadd.f32 %v681_v13, %v673_v6  ;;  %v542_v6 = vpop.permute.xlu0 %541  ;;  %s2591_s15 = sld [smem:[#allocation4 + $0xc]] }
  0xfa   : > { %v622_v9 = vmul.f32 %v3206_v17, %v2501_v40  ;;  %v698_v50 = vmul.f32 %v3207_v34, %v2497_v29  ;;  %v3208_v1 = vmov %v3206_v17  ;;  %v783_v54 = vmul.f32 %v3209_v33, %v2497_v29  ;;  %s2607_s24 = sld [smem:[#allocation4 + $0x58]] }
  0xfb   : > { %v621_v48 = vmul.f32 %v3208_v1, %v2497_v29  ;;  %v3210_v12 = vmov %v3209_v33  ;;  %v3211_v5 = vmov %v3207_v34  ;;  %v3212_v20 = vstv %s2131_s18  ;;  %v544_v34 = vpop.permute.xlu1 %543  ;;  %s2681_s7 = sld [smem:[#allocation4 + $0x28]] }
  0xfc   : > { %v784_v11 = vmul.f32 %v3210_v12, %v2501_v40  ;;  %v699_v55 = vmul.f32 %v3211_v5, %v2501_v40  ;;  %v2530_v63 = vmul.f32 %v3212_v20, %v2435_v30  ;;  %v624_v16 = vadd.f32 %v622_v9, %v619_v14 }
  0xfd   : > { %v700_v0 = vadd.f32 %v698_v50, %v695_v26  ;;  %v623_v47 = vadd.f32 %v621_v48, %v618_v32  ;;  %v778_v53 = vadd.f32 %v2254_v28, %v768_v10  ;;  %v785_v24 = vadd.f32 %v783_v54, %v780_v49 }
  0xfe   : > { %v786_v18 = vadd.f32 %v784_v11, %v781_v15  ;;  %v701_v41 = vadd.f32 %v699_v55, %v696_v61  ;;  %v921_v17 = vadd.f32 %v919_v21, %v911_v31  ;;  %v626_v13 = vadd.f32 %v624_v16, %v616_v51 }
  0xff   : > { %v702_v1 = vadd.f32 %v700_v0, %v692_v42  ;;  %v625_v33 = vadd.f32 %v623_v47, %v615_v58  ;;  %v693_v12 = vadd.f32 %v2333_v2, %v683_v8  ;;  %v547_v28 = vsel %vm545_vm5, %v2437_v62, %v544_v34 }
 0x100   : > { %v549_v14 = vsel %vm545_vm5, %v544_v34, %v2437_v62  ;;  %v546_v51 = vsel %vm545_vm5, %v538_v59, %v542_v6  ;;  %v548_v2 = vsel %vm545_vm5, %v542_v6, %v538_v59  ;;  %v3213_v42 = vrot.slane %v1980_v37, 5 }
 0x101   : > { %v3214_v58 = vrot.slane %v1982_v38, 5  ;;  %v787_v10 = vadd.f32 %v785_v24, %v777_v27  ;;  %v788_v59 = vadd.f32 %v786_v18, %v778_v53  ;;  %v2563_v31 = vadd.f32 %v701_v41, %v693_v12  ;;  %v565_v18 = vpop.permute.xlu2 %564  ;;  %3238 = sst [smem:[#allocation30_spill]] %s2681_s7 }
 0x102   : > { %v2549_v26 = vmul.f32 %v3213_v42, %v547_v28  ;;  %v3215_v49 = vmov %v3213_v42  ;;  %v2565_v21 = vadd.f32 %v929_v56, %v921_v17  ;;  %v3217_v9 = vstv %s2181_s9  ;;  %s2686_s9 = sld [smem:[#allocation4 + $0x44]] }
 0x103   : > { %v2553_v32 = vmul.f32 %v3214_v58, %v549_v14  ;;  %v2557_v62 = vmul.f32 %v3215_v49, %v546_v51  ;;  %v3216_v15 = vmov %v3214_v58  ;;  %v3218_v48 = vstv %s2184_s10  ;;  %s2691_s10 = sld [smem:[#allocation4 + $0x4b]] }
 0x104   : > { %v2561_v61 = vmul.f32 %v3216_v15, %v548_v2  ;;  %v3219_v11 = vstv %s2202_s6  ;;  %v3220_v5 = vstv %s2206_s27  ;;  %v3221_v55 = vmov %v3217_v9  ;;  %v563_v15 = vpop.permute.xlu1 %562  ;;  %s2642_s27 = sld [smem:[#allocation4 + $0x5f]] }
 0x105   : > { %v632_v54 = vmul.f32 %v3218_v48, %v2553_v32  ;;  %v705_v8 = vmul.f32 %v3219_v11, %v2557_v62  ;;  %v708_v27 = vmul.f32 %v3220_v5, %v2549_v26  ;;  %v628_v20 = vmul.f32 %v3221_v55, %v2557_v62  ;;  %s2673_s6 = sld [smem:[#allocation4 + $0x3d]] }
 0x106   : > { %v629_v50 = vmul.f32 %v3217_v9, %v2561_v61  ;;  %v3222_v56 = vmov %v3218_v48  ;;  %v3223_v0 = vstv %s2229_s2  ;;  %v3224_v53 = vstv %s2242_s11  ;;  %v561_v9 = vpop.permute.xlu0 %560  ;;  %s2610_s2 = sld [smem:[#allocation4 + $0x13]] }
 0x107   : > { %v631_v16 = vmul.f32 %v3222_v56, %v2549_v26  ;;  %v790_v47 = vmul.f32 %v3223_v0, %v2557_v62  ;;  %v793_v24 = vmul.f32 %v3224_v53, %v2549_v26  ;;  %v710_v17 = vadd.f32 %v708_v27, %v705_v8  ;;  %s2696_s11 = sld [smem:[#allocation4 + $0x52]] }
 0x108   : > { %v634_v41 = vadd.f32 %v632_v54, %v629_v50  ;;  %v3225_v34 = vmov %v3223_v0  ;;  %v3226_v12 = vmov %v3224_v53  ;;  %v3227_v2 = vmov %v3219_v11 }
 0x109   : > { %v791_v6 = vmul.f32 %v3225_v34, %v2561_v61  ;;  %v794_v28 = vmul.f32 %v3226_v12, %v2553_v32  ;;  %v633_v14 = vadd.f32 %v631_v16, %v628_v20  ;;  %v795_v51 = vadd.f32 %v793_v24, %v790_v47  ;;  %3240 = sst [smem:[#allocation32_spill]] %s2691_s10 }
 0x10a   : > { %v706_v42 = vmul.f32 %v3227_v2, %v2561_v61  ;;  %v3228_v58 = vmov %v3220_v5  ;;  %v636_v50 = vadd.f32 %v634_v41, %v626_v13  ;;  %v712_v48 = vadd.f32 %v710_v17, %v702_v1 }
 0x10b   : > { %v709_v49 = vmul.f32 %v3228_v58, %v2553_v32  ;;  %v796_v54 = vadd.f32 %v794_v28, %v791_v6  ;;  %v935_v11 = vstv %s2535_s3  ;;  %v567_v8 = vsel %vm566_vm6, %v2507_v4, %v563_v15  ;;  %s3260_s3 = sld [smem:[#allocation31_spill]] }
 0x10c   : > { %v569_v5 = vsel %vm566_vm6, %v563_v15, %v2507_v4  ;;  %v568_v13 = vsel %vm566_vm6, %v561_v9, %v565_v18  ;;  %v570_v1 = vsel %vm566_vm6, %v565_v18, %v561_v9  ;;  %v3229_v27 = vrot.slane %v1980_v37, 6 }
 0x10d   : > { %v3230_v20 = vrot.slane %v1982_v38, 6  ;;  %v635_v53 = vadd.f32 %v633_v14, %v625_v33  ;;  %v797_v24 = vadd.f32 %v795_v51, %v787_v10  ;;  %v711_v18 = vadd.f32 %v709_v49, %v706_v42 }
 0x10e   : > { %v2626_v55 = vmul.f32 %v3229_v27, %v567_v8  ;;  %v3231_v4 = vmov %v3229_v27  ;;  %v937_v37 = vmul.f32 %v935_v11, %v2501_v40  ;;  %v3233_v41 = vstv %s2283_s17  ;;  %s1763_s17 = smov 3  }
 0x10f   : > { %v2630_v56 = vmul.f32 %v3230_v20, %v569_v5  ;;  %v2634_v16 = vmul.f32 %v3231_v4, %v568_v13  ;;  %v3232_v0 = vmov %v3230_v20  ;;  %v3234_v38 = vstv %s2297_s16  ;;  %s1764_s16 = smov 2  }
 0x110   : > { %v2638_v47 = vmul.f32 %v3232_v0, %v570_v1  ;;  %v3235_v6 = vstv %s2305_s0  ;;  %v3236_v10 = vmov %v3233_v41  ;;  %v3237_v14 = vmov %v3234_v38  ;;  %s3241_s0 = sld [smem:[#allocation36_spill]] }
 0x111   : > { %v639_v17 = vmul.f32 %v3233_v41, %v2630_v56  ;;  %v715_v12 = vmul.f32 %v3235_v6, %v2626_v55  ;;  %v718_v33 = vmul.f32 %v717_v52, %v2634_v16  ;;  %v638_v28 = vmul.f32 %v3236_v10, %v2626_v55 }
 0x112   : > { %v642_v34 = vmul.f32 %v3234_v38, %v2638_v47  ;;  %v641_v51 = vmul.f32 %v3237_v14, %v2634_v16  ;;  %v800_v2 = vmul.f32 %v799_v35, %v2626_v55  ;;  %v803_v42 = vmul.f32 %v802_v19, %v2634_v16 }
 0x113   : > { %v720_v49 = vadd.f32 %v718_v33, %v715_v12  ;;  %v801_v15 = vmul.f32 %v799_v35, %v2630_v56  ;;  %v804_v9 = vmul.f32 %v802_v19, %v2638_v47  ;;  %v798_v13 = vadd.f32 %v796_v54, %v788_v59 }
 0x114   : > { %v644_v58 = vadd.f32 %v642_v34, %v639_v17  ;;  %v643_v8 = vadd.f32 %v641_v51, %v638_v28  ;;  %v805_v5 = vadd.f32 %v803_v42, %v800_v2  ;;  %v3239_v1 = vmov %v3235_v6 }
 0x115   : > { %v716_v27 = vmul.f32 %v3239_v1, %v2630_v56  ;;  %v722_v4 = vadd.f32 %v720_v49, %v712_v48  ;;  %v806_v0 = vadd.f32 %v804_v9, %v801_v15  ;;  %v719_v35 = vmul.f32 %v717_v52, %v2638_v47 }
 0x116   : > { %v646_v20 = vadd.f32 %v644_v58, %v636_v50  ;;  %v645_v19 = vadd.f32 %v643_v8, %v635_v53  ;;  %v713_v41 = vadd.f32 %v711_v18, %v2563_v31  ;;  %v939_v59 = vadd.f32 %v937_v37, %v2530_v63 }
 0x117   : > { %v942_v54 = vstv %s2599_s20  ;;  %724 = vrot.lane.b32.xlu2 %v722_v4, %s1764_s16  ;;  %v807_v52 = vadd.f32 %v805_v5, %v797_v24  ;;  %v721_v50 = vadd.f32 %v719_v35, %v716_v27  ;;  %v945_v63 = vstv %s2607_s24  ;;  %s3261_s20 = sld [smem:[#allocation32_spill]] }
 0x118   : > { %649 = vrot.lane.b32.xlu1 %v646_v20, %s1763_s17  ;;  %v944_v31 = vmul.f32 %v942_v54, %v2561_v61  ;;  %647 = vrot.lane.b32.xlu0 %v645_v19, %s1763_s17  ;;  %v808_v48 = vadd.f32 %v806_v0, %v798_v13  ;;  %v947_v53 = vmul.f32 %v945_v63, %v2553_v32  ;;  %v952_v18 = vstv %s2640_s25  ;;  %s2759_s17 = sld [smem:[#allocation4 + $0x14]]  ;;  %s1768_s25 = smov 125  }
 0x119   : > { %v955_v37 = vstv %s2642_s27  ;;  %v941_v24 = vadd.f32 %v939_v59, %v2565_v21  ;;  %v954_v17 = vmul.f32 %v952_v18, %v2630_v56  ;;  %v3243_v34 = vstv %s3241_s0  ;;  %s3264_s24 = sld [smem:[#allocation30_spill]] }
 0x11a   : > { %v957_v38 = vmul.f32 %v955_v37, %v2638_v47  ;;  %v981_v6 = vmul.f32 %v3243_v34, %v2292_v25  ;;  %v949_v12 = vadd.f32 %v947_v53, %v944_v31  ;;  %v985_v33 = vstv %s2591_s15  ;;  %s3265_s27 = sld [smem:[#allocation34_spill]] }
 0x11b   : > { %v988_v10 = vstv %s2673_s6  ;;  %v995_v21 = vstv %s2610_s2  ;;  %v723_v28 = vadd.f32 %v721_v50, %v713_v41  ;;  %v986_v51 = vmul.f32 %v985_v33, %v2175_v46  ;;  %s1394_s15 = sld [smem:[#allocation4 + $0x3b]] }
 0x11c   : > { %v959_v14 = vadd.f32 %v957_v38, %v954_v17  ;;  %v989_v2 = vmul.f32 %v988_v10, %v2371_v7  ;;  %v983_v42 = vadd.f32 %v981_v6, %v2148_v22  ;;  %v996_v58 = vmul.f32 %v995_v21, %v2167_v60  ;;  %s1345_s2 = sld [smem:[#allocation4 + $0xa]] }
 0x11d   : > { %v3134_v49 = vstv %s2686_s9  ;;  %v3133_v15 = vstv %s2622_s14  ;;  %v3132_v13 = vstv %s2691_s10  ;;  %v951_v1 = vadd.f32 %v949_v12, %v941_v24  ;;  %s3244_s10 = sld [smem:[#allocation29_spill]] }
 0x11e   : > { %v991_v9 = vadd.f32 %v989_v2, %v986_v51  ;;  %v999_v8 = vmul.f32 %v3134_v49, %v2379_v23  ;;  %v1006_v5 = vmul.f32 %v3133_v15, %v2010_v45  ;;  %v1009_v22 = vmul.f32 %v3132_v13, %v2003_v43  ;;  %v3245_v51 = vld [vmem:[#allocation37_spill] sm:$0xff]  ;;  %v3259_v49 = vld [vmem:[#allocation33_spill] sm:$0xff]  ;;  %s2932_s6 = sld [smem:[#allocation4 + $0x11]] }
 0x11f   : > { %v3131_v27 = vstv %s2659_s23  ;;  %v3130_v20 = vstv %s2696_s11  ;;  %811 = vrot.lane.b32.xlu2 %v808_v48, %s1765_s1  ;;  %v3129_v19 = vstv %s2681_s7  ;;  %v961_v17 = vadd.f32 %v959_v14, %v951_v1  ;;  %s2784_s7 = sld [smem:[#allocation4 + $0x1b]] }
 0x120   : > { %809 = vrot.lane.b32.xlu1 %v807_v52, %s1765_s1  ;;  %v993_v4 = vadd.f32 %v991_v9, %v983_v42  ;;  %v1001_v0 = vadd.f32 %v999_v8, %v996_v58  ;;  %v1016_v35 = vmul.f32 %v3131_v27, %v2431_v3  ;;  %726 = vrot.lane.b32.xlu0 %v723_v28, %s1764_s16  ;;  %v3128_v50 = vstv %s2710_s26  ;;  %s2769_s1 = sld [smem:[#allocation4 + $0x37]] }
 0x121   : > { %v1011_v41 = vadd.f32 %v1009_v22, %v1006_v5  ;;  %v1019_v59 = vmul.f32 %v3130_v20, %v2497_v29  ;;  %v1026_v52 = vmul.f32 %v3129_v19, %v2557_v62  ;;  %v1029_v48 = vmul.f32 %v3128_v50, %v2549_v26  ;;  %s2776_s16 = sld [smem:[#allocation4 + $0x3e]] }
 0x122   : > { %v1003_v31 = vadd.f32 %v1001_v0, %v993_v4  ;;  %v3127_v53 = vstv %s2703_s22  ;;  %v3126_v24 = vstv %s2719_s21  ;;  %v3247_v58 = vstv %s2028_s4  ;;  %s2792_s26 = sld [smem:[#allocation4 + $0x22]] }
 0x123   : > { %v1021_v38 = vadd.f32 %v1019_v59, %v1016_v35  ;;  %v1036_v34 = vmul.f32 %v3127_v53, %v2626_v55  ;;  %v1039_v6 = vmul.f32 %v3126_v24, %v2634_v16  ;;  %v1031_v28 = vadd.f32 %v1029_v48, %v1026_v52  ;;  %s2814_s4 = sld [smem:[#allocation4 + $0x4c]] }
 0x124   : > { %v1013_v12 = vadd.f32 %v1011_v41, %v1003_v31  ;;  %v3246_v2 = vstv %s3244_s10  ;;  %v898_v14 = vmul.f32 %v3247_v58, %v2292_v25  ;;  %v3248_v9 = vstv %s1964_s30  ;;  %s2806_s10 = sld [smem:[#allocation4 + $0x45]] }
 0x125   : > { %v895_v42 = vmul.f32 %v3246_v2, %v3245_v51  ;;  %v903_v8 = vmul.f32 %v3248_v9, %v2175_v46  ;;  %v3249_v5 = vstv %s2138_s28  ;;  %v3250_v22 = vstv %s1966_s5  ;;  %s2819_s30 = sld [smem:[#allocation4 + $0x29]]  ;;  %s1766_s5 = smov 127  }
 0x126   : > { %v906_v1 = vmul.f32 %v3249_v5, %v2371_v7  ;;  %v913_v4 = vmul.f32 %v3250_v22, %v2167_v60  ;;  %v3251_v0 = vstv %s2163_s8  ;;  %v1023_v41 = vadd.f32 %v1021_v38, %v1013_v12  ;;  %s2843_s28 = sld [smem:[#allocation4 + $0x30]]  ;;  %s1767_s8 = smov 126  }
 0x127   : > { %v916_v35 = vmul.f32 %v3251_v0, %v2379_v23  ;;  %v1041_v59 = vadd.f32 %v1039_v6, %v1036_v34  ;;  %v3252_v52 = vstv %s2083_s19  ;;  %v3253_v48 = vstv %s2272_s12  ;;  %s2831_s19 = sld [smem:[#allocation4 + $0x53]] }
 0x128   : > { %v923_v31 = vmul.f32 %v3252_v52, %v2010_v45  ;;  %v926_v2 = vmul.f32 %v3253_v48, %v2003_v43  ;;  %v900_v58 = vadd.f32 %v898_v14, %v895_v42  ;;  %v908_v9 = vadd.f32 %v906_v1, %v903_v8  ;;  %964 = vrot.lane.b32.xlu1 %v961_v17, %s1766_s5  ;;  %s2848_s12 = sld [smem:[#allocation4 + $0x61]] }
 0x129   : > { %v918_v5 = vadd.f32 %v916_v35, %v913_v4  ;;  %v936_v22 = vmul.f32 %v935_v11, %v2497_v29  ;;  %v1033_v38 = vadd.f32 %v1031_v28, %v1023_v41  ;;  %v3254_v34 = vstv %s2131_s18  ;;  %s2839_s18 = sld [smem:[#allocation4 + $0x5a]] }
 0x12a   : > { %v933_v6 = vmul.f32 %v3254_v34, %v2431_v3  ;;  %v943_v12 = vmul.f32 %v942_v54, %v2557_v62  ;;  %v946_v42 = vmul.f32 %v945_v63, %v2549_v26  ;;  %v910_v11 = vadd.f32 %v908_v9, %v900_v58 }
 0x12b   : > { %v928_v14 = vadd.f32 %v926_v2, %v923_v31  ;;  %v953_v8 = vmul.f32 %v952_v18, %v2626_v55  ;;  %v956_v17 = vmul.f32 %v955_v37, %v2634_v16  ;;  %v1043_v28 = vadd.f32 %v1041_v59, %v1033_v38 }
 0x12c   : > { %v938_v1 = vadd.f32 %v936_v22, %v933_v6  ;;  %v1060_v54 = vstv %s2746_s29  ;;  %v1063_v4 = vstv %s2769_s1  ;;  %v920_v63 = vadd.f32 %v918_v5, %v910_v11  ;;  %s2970_s29 = sld [smem:[#allocation4 + $0x2d]] }
 0x12d   : > { %v948_v0 = vadd.f32 %v946_v42, %v943_v12  ;;  %v1061_v18 = vmul.f32 %v1060_v54, %v3245_v51  ;;  %v1064_v35 = vmul.f32 %v1063_v4, %v2292_v25  ;;  %1045 = vrot.lane.b32.xlu2 %v1043_v28, %s1767_s8  ;;  %v958_v37 = vadd.f32 %v956_v17, %v953_v8  ;;  %s3276_s1 = sld [smem:[#allocation21_spill]] }
 0x12e   : > { %v1068_v41 = vstv %s2753_s13  ;;  %v1071_v59 = vstv %s2776_s16  ;;  %v1078_v52 = vstv %s2759_s17  ;;  %v930_v31 = vadd.f32 %v928_v14, %v920_v63  ;;  %s2974_s13 = sld [smem:[#allocation4 + $0x5e]] }
 0x12f   : > { %v1066_v48 = vadd.f32 %v1064_v35, %v1061_v18  ;;  %v1069_v2 = vmul.f32 %v1068_v41, %v2175_v46  ;;  %v1072_v58 = vmul.f32 %v1071_v59, %v2371_v7  ;;  %v1079_v9 = vmul.f32 %v1078_v52, %v2167_v60  ;;  %s3275_s17 = sld [smem:[#allocation28_spill]] }
 0x130   : > { %v1081_v5 = vstv %s2806_s10  ;;  %v1088_v22 = vstv %s2784_s7  ;;  %v1091_v38 = vstv %s2814_s4  ;;  %v940_v34 = vadd.f32 %v938_v1, %v930_v31  ;;  %s2934_s7 = sld [smem:[#allocation4 + $0x42]] }
 0x131   : > { %v1074_v6 = vadd.f32 %v1072_v58, %v1069_v2  ;;  %v1082_v12 = vmul.f32 %v1081_v5, %v2379_v23  ;;  %v1089_v42 = vmul.f32 %v1088_v22, %v2010_v45  ;;  %v1092_v11 = vmul.f32 %v1091_v38, %v2003_v43 }
 0x132   : > { %v1098_v14 = vstv %s2792_s26  ;;  %v1101_v8 = vstv %s2831_s19  ;;  %v1108_v17 = vstv %s2819_s30  ;;  %v950_v28 = vadd.f32 %v948_v0, %v940_v34  ;;  %v3255_v0 = vld [vmem:[#allocation41_spill] sm:$0xff]  ;;  %s2962_s26 = sld [smem:[#allocation4 + $0x26]] }
 0x133   : > { %v1076_v63 = vadd.f32 %v1074_v6, %v1066_v48  ;;  %v1084_v18 = vadd.f32 %v1082_v12, %v1079_v9  ;;  %v1099_v35 = vmul.f32 %v1098_v14, %v2431_v3  ;;  %v1094_v24 = vadd.f32 %v1092_v11, %v1089_v42  ;;  %v3256_v12 = vld [vmem:[#allocation38_spill] sm:$0xff]  ;;  %v3257_v11 = vld [vmem:[#allocation40_spill] sm:$0xff]  ;;  %s1436_s10 = sshll.u32 %s3276_s1, 1 }
 0x134   : > { %v1102_v1 = vmul.f32 %v1101_v8, %v2497_v29  ;;  %v1109_v31 = vmul.f32 %v1108_v17, %v2557_v62  ;;  %v1111_v2 = vstv %s2839_s18  ;;  %v960_v58 = vadd.f32 %v958_v37, %v950_v28 }
 0x135   : > { %v1086_v53 = vadd.f32 %v1084_v18, %v1076_v63  ;;  %v1112_v50 = vmul.f32 %v1111_v2, %v2549_v26  ;;  %v1118_v19 = vstv %s2843_s28  ;;  %v1121_v13 = vstv %s2848_s12  ;;  %v3258_v63 = vld [vmem:[#allocation39_spill] sm:$0xff]  ;;  %s1335_s16 = sshll.u32 %s3275_s17, 1 }
 0x136   : > { %v1104_v20 = vadd.f32 %v1102_v1, %v1099_v35  ;;  %v1119_v27 = vmul.f32 %v1118_v19, %v2626_v55  ;;  %v1065_v48 = vmul.f32 %v1063_v4, %v3255_v0  ;;  %962 = vrot.lane.b32.xlu0 %v960_v58, %s1766_s5  ;;  %v1122_v6 = vmul.f32 %v1121_v13, %v2634_v16  ;;  %s3277_s5 = sld [smem:[#allocation46_spill]]  ;;  %s272_s18 = scalar_lea.vmem [#allocation12], %s1335_s16 }
 0x137   : > { %v1096_v9 = vadd.f32 %v1094_v24, %v1086_v53  ;;  %v1114_v34 = vadd.f32 %v1112_v50, %v1109_v31  ;;  %v1062_v42 = vmul.f32 %v1060_v54, %v3256_v12  ;;  %v1070_v37 = vmul.f32 %v1068_v41, %v3257_v11  ;;  %s1205_s28 = sshll.u32 %s272_s18, 4  ;;  %s1206_s28 = int_to_ptr.vmem [resolvable:$true] %s1205_s28 }
 0x138   : > { %v1073_v28 = vmul.f32 %v1071_v59, %v2375_v57  ;;  %v1080_v18 = vmul.f32 %v1078_v52, %v3258_v63  ;;  %v1083_v35 = vmul.f32 %v1081_v5, %v2383_v36  ;;  %v1124_v15 = vadd.f32 %v1122_v6, %v1119_v27 }
 0x139   : > { %v1106_v1 = vadd.f32 %v1104_v20, %v1096_v9  ;;  %v1090_v4 = vmul.f32 %v1088_v22, %v3259_v49  ;;  %v1093_v58 = vmul.f32 %v1091_v38, %v2007_v44  ;;  %v1067_v50 = vadd.f32 %v1065_v48, %v1062_v42 }
 0x13a   : > { %v1075_v53 = vadd.f32 %v1073_v28, %v1070_v37  ;;  %v1085_v24 = vadd.f32 %v1083_v35, %v1080_v18  ;;  %v1103_v54 = vmul.f32 %v1101_v8, %v2501_v40  ;;  %v1100_v59 = vmul.f32 %v1098_v14, %v2435_v30 }
 0x13b   : > { %v1116_v41 = vadd.f32 %v1114_v34, %v1106_v1  ;;  %v1110_v52 = vmul.f32 %v1108_v17, %v2561_v61  ;;  %v1113_v27 = vmul.f32 %v1111_v2, %v2553_v32  ;;  %v1095_v5 = vadd.f32 %v1093_v58, %v1090_v4 }
 0x13c   : > { %v1077_v20 = vadd.f32 %v1075_v53, %v1067_v50  ;;  %v1120_v22 = vmul.f32 %v1118_v19, %v2630_v56  ;;  %v1123_v38 = vmul.f32 %v1121_v13, %v2638_v47  ;;  %v1105_v48 = vadd.f32 %v1103_v54, %v1100_v59  ;;  %s1203_s19 = scalar_lea.hbm %s3277_s5, %s1436_s10 }
 0x13d   : > { %v1126_v31 = vadd.f32 %v1124_v15, %v1116_v41  ;;  %v1115_v8 = vadd.f32 %v1113_v27, %v1110_v52  ;;  %v3262_v9 = vstv %s3241_s0  ;;  %v3263_v2 = vstv %s3260_s3  ;;  %s2948_s0 = sld [smem:[#allocation4 + $0x50]]  ;;  %s1193_s3 = scalar_lea.sflag [#allocation6], %s3275_s17 }
 0x13e   : > { %v982_v14 = vmul.f32 %v3262_v9, %v3255_v0  ;;  %v1087_v17 = vadd.f32 %v1085_v24, %v1077_v20  ;;  %v979_v34 = vmul.f32 %v3263_v2, %v3256_v12  ;;  %v987_v6 = vmul.f32 %v985_v33, %v3257_v11 }
 0x13f   : > { %v990_v13 = vmul.f32 %v988_v10, %v2375_v57  ;;  %1128 = vrot.lane.b32.xlu1 %v1126_v31, %s1768_s25  ;;  %v1125_v15 = vadd.f32 %v1123_v38, %v1120_v22  ;;  %v997_v19 = vmul.f32 %v995_v21, %v3258_v63  ;;  %v3266_v42 = vstv %s2686_s9  ;;  %s2936_s9 = sld [smem:[#allocation4 + $0x18]] }
 0x140   : > { %v1000_v37 = vmul.f32 %v3266_v42, %v2383_v36  ;;  %v3267_v28 = vstv %s2622_s14  ;;  %v1097_v35 = vadd.f32 %v1095_v5, %v1087_v17  ;;  %v984_v33 = vadd.f32 %v982_v14, %v979_v34  ;;  %s1387_s14 = sld [smem:[#allocation4 + $0x34]] }
 0x141   : > { %v1007_v18 = vmul.f32 %v3267_v28, %v3259_v49  ;;  %v992_v1 = vadd.f32 %v990_v13, %v987_v6  ;;  %v3268_v10 = vstv %s3261_s20  ;;  %v3269_v50 = vstv %s2659_s23  ;;  %s1338_s23 = sld [smem:[#allocation4 + $0x3]] }
 0x142   : > { %v1010_v4 = vmul.f32 %v3268_v10, %v2007_v44  ;;  %v1002_v58 = vadd.f32 %v1000_v37, %v997_v19  ;;  %v1017_v53 = vmul.f32 %v3269_v50, %v2435_v30  ;;  %v3270_v24 = vstv %s2696_s11  ;;  %s2938_s11 = sld [smem:[#allocation4 + $0x49]] }
 0x143   : > { %v1020_v21 = vmul.f32 %v3270_v24, %v2501_v40  ;;  %v3271_v54 = vstv %s3264_s24  ;;  %v1107_v59 = vadd.f32 %v1105_v48, %v1097_v35  ;;  %v994_v52 = vadd.f32 %v992_v1, %v984_v33 }
 0x144   : > { %v1027_v41 = vmul.f32 %v3271_v54, %v2561_v61  ;;  %v1012_v27 = vadd.f32 %v1010_v4, %v1007_v18  ;;  %v3272_v20 = vstv %s3265_s27  ;;  %v3273_v22 = vstv %s2703_s22  ;;  %s2952_s22 = sld [smem:[#allocation4 + $0x1f]] }
 0x145   : > { %v1030_v5 = vmul.f32 %v3272_v20, %v2553_v32  ;;  %v1037_v38 = vmul.f32 %v3273_v22, %v2630_v56  ;;  %v1117_v31 = vadd.f32 %v1115_v8, %v1107_v59  ;;  %v1004_v9 = vadd.f32 %v1002_v58, %v994_v52 }
 0x146   : > { %v1022_v14 = vadd.f32 %v1020_v21, %v1017_v53  ;;  %v3274_v17 = vstv %s2719_s21  ;;  %v835_v8 = vstv %s1394_s15  ;;  %v832_v28 = vstv %s1345_s2  ;;  %s2967_s21 = sld [smem:[#allocation4 + $0x57]]  ;;  %s1678_s15 = scalar_lea.hbm %s3277_s5, 4 }
 0x147   : > { %v1040_v2 = vmul.f32 %v3274_v17, %v2638_v47  ;;  %v1127_v34 = vadd.f32 %v1125_v15, %v1117_v31  ;;  %v1014_v6 = vadd.f32 %v1012_v27, %v1004_v9  ;;  %v1032_v13 = vadd.f32 %v1030_v5, %v1027_v41 }
 0x148   : > { %v827_v15 = vstv %s1387_s14  ;;  %v836_v18 = vmul.f32 %v835_v8, %v2371_v7  ;;  %v824_v33 = vstv %s1338_s23  ;;  %v833_v10 = vmul.f32 %v832_v28, %v2175_v46 }
 0x149   : > { %1130 = vrot.lane.b32.xlu2 %v1127_v34, %s1768_s25  ;;  %v1024_v19 = vadd.f32 %v1022_v14, %v1014_v6  ;;  %v1042_v48 = vadd.f32 %v1040_v2, %v1037_v38  ;;  %v828_v1 = vmul.f32 %v827_v15, %v2292_v25  ;;  %v837_v4 = vmul.f32 %v835_v8, %v2375_v57 }
 0x14a   : > { %v829_v53 = vmul.f32 %v827_v15, %v3255_v0  ;;  %v845_v24 = vstv %s2934_s7  ;;  %v825_v7 = vmul.f32 %v824_v33, %v3245_v51  ;;  %v834_v21 = vmul.f32 %v832_v28, %v3257_v11 }
 0x14b   : > { %v1034_v42 = vadd.f32 %v1032_v13, %v1024_v19  ;;  %v838_v54 = vadd.f32 %v836_v18, %v833_v10  ;;  %v842_v25 = vstv %s2932_s6  ;;  %v826_v46 = vmul.f32 %v824_v33, %v3256_v12  ;;  %v2983_v19 = vld [vmem:[#allocation9 + $0x8] sm:$0x7f] }
 0x14c   : > { %v852_v41 = vstv %s2936_s9  ;;  %v855_v57 = vstv %s2938_s11  ;;  %v830_v59 = vadd.f32 %v828_v1, %v825_v7  ;;  %v839_v52 = vadd.f32 %v837_v4, %v834_v21 }
 0x14d   : > { %v1044_v37 = vadd.f32 %v1042_v48, %v1034_v42  ;;  %v846_v27 = vmul.f32 %v845_v24, %v2379_v23  ;;  %v831_v20 = vadd.f32 %v829_v53, %v826_v46  ;;  %v843_v0 = vmul.f32 %v842_v25, %v2167_v60 }
 0x14e   : > { %v840_v5 = vadd.f32 %v838_v54, %v830_v59  ;;  %v847_v51 = vmul.f32 %v845_v24, %v2383_v36  ;;  %v853_v11 = vmul.f32 %v852_v41, %v2010_v45  ;;  %v856_v12 = vmul.f32 %v855_v57, %v2003_v43 }
 0x14f   : > { %1047 = vrot.lane.b32.xlu0 %v1044_v37, %s1767_s8  ;;  %v844_v22 = vmul.f32 %v842_v25, %v3258_v63  ;;  %v841_v23 = vadd.f32 %v839_v52, %v831_v20  ;;  %v848_v38 = vadd.f32 %v846_v27, %v843_v0  ;;  %v854_v60 = vmul.f32 %v852_v41, %v3259_v49  ;;  %v2981_v49 = vld [vmem:[#allocation9] sm:$0x7f]  ;;  %s1207_s8 = sshll.u32 %s1203_s19, 4  ;;  %s1208_s8 = int_to_ptr.hbm [resolvable:$true] %s1207_s8 }
 0x150   : > { %v857_v31 = vmul.f32 %v855_v57, %v2007_v44  ;;  %v865_v36 = vstv %s2948_s0  ;;  %v858_v43 = vadd.f32 %v856_v12, %v853_v11  ;;  %v862_v17 = vstv %s2952_s22  ;;  %s1672_s20 = sshra.s32 %s1208_s8, 4  ;;  %s1673_s20 = int_to_ptr.hbm [resolvable:$true] %s1672_s20 }
 0x151   : > { %v849_v14 = vadd.f32 %v847_v51, %v844_v22  ;;  %v850_v45 = vadd.f32 %v848_v38, %v840_v5  ;;  %v866_v13 = vmul.f32 %v865_v36, %v2497_v29  ;;  %v863_v44 = vmul.f32 %v862_v17, %v2431_v3  ;;  %s1674_s24 = scalar_lea.hbm %s1673_s20, 2  ;;  %p1679_p11 = scmp.lt.s32.totalorder %s1673_s20, %s3277_s5 }
 0x152   : > { %v859_v6 = vadd.f32 %v857_v31, %v854_v60  ;;  %v864_v42 = vmul.f32 %v862_v17, %v2435_v30  ;;  %v867_v37 = vmul.f32 %v865_v36, %v2501_v40  ;;  %v872_v8 = vstv %s2962_s26  ;;  %p1675_p1 = scmp.ne.s32.totalorder %s1673_s20, %s1674_s24  ;;  %p1680_p12 = scmp.lt.s32.totalorder %s1678_s15, %s1674_s24 }
 0x153   : > { %v851_v34 = vadd.f32 %v849_v14, %v841_v23  ;;  %v860_v48 = vadd.f32 %v858_v43, %v850_v45  ;;  %v733_v29 = vrot.slane %v2981_v49, 1  ;;  %v734_v15 = vrot.slane %v2983_v19, 1 }
 0x154   : > { %v875_v28 = vstv %s2967_s21  ;;  %v868_v1 = vadd.f32 %v866_v13, %v863_v44  ;;  %v873_v10 = vmul.f32 %v872_v8, %v2557_v62  ;;  %v874_v4 = vmul.f32 %v872_v8, %v2561_v61  ;;  %p1676_p4 = pnand %p1675_p1, %p1869_p3  ;;  %p1681_p13 = por %p1680_p12, %p1679_p11 }
 0x155   : > { %v861_v33 = vadd.f32 %v859_v6, %v851_v34  ;;  %v882_v53 = vstv %s2970_s29  ;;  %v885_v30 = vstv %s2974_s13  ;;  %v876_v7 = vmul.f32 %v875_v28, %v2549_v26 }
 0x156   : > { %v877_v21 = vmul.f32 %v875_v28, %v2553_v32  ;;  %v869_v62 = vadd.f32 %v867_v37, %v864_v42  ;;  %v883_v61 = vmul.f32 %v882_v53, %v2626_v55  ;;  %v884_v46 = vmul.f32 %v882_v53, %v2630_v56  ;;  %p1677_p8 = pneg %p1676_p4 }
 0x157   : > { %v886_v41 = vmul.f32 %v885_v30, %v2634_v16  ;;  %v887_v57 = vmul.f32 %v885_v30, %v2638_v47  ;;  %v816_v32 = vrot.slane %v2981_v49, 2  ;;  %v878_v56 = vadd.f32 %v876_v7, %v873_v10 }
 0x158   : > { %v879_v16 = vadd.f32 %v877_v21, %v874_v4  ;;  %v870_v0 = vadd.f32 %v868_v1, %v860_v48  ;;  %v871_v5 = vadd.f32 %v869_v62, %v861_v33  ;;  %v969_v23 = vrot.slane %v2981_v49, 4  ;;  %p1682_p0 = pnand %p1681_p13, %p1677_p8 }
 0x159   : > { %v888_v51 = vadd.f32 %v886_v41, %v883_v61  ;;  %v889_v11 = vadd.f32 %v887_v57, %v884_v46  ;;  %v970_v38 = vrot.slane %v2983_v19, 4  ;;  %v1052_v6 = vrot.slane %v2981_v49, 5 }
 0x15a   : > { %v880_v60 = vadd.f32 %v878_v56, %v870_v0  ;;  %v881_v31 = vadd.f32 %v879_v16, %v871_v5  ;;  %v1053_v13 = vrot.slane %v2983_v19, 5  ;;  %v1135_v37 = vrot.slane %v2981_v49, 6 }
 0x15b   : > { %v1136_v8 = vrot.slane %v2983_v19, 6  ;;  %vm1184_vm4 = vcmask 1040384  }
 0x15c   : > { %v890_v43 = vadd.f32 %v888_v51, %v880_v60  ;;  %v891_v17 = vadd.f32 %v889_v11, %v881_v31 }
 0x171   : > { %v725_v58 = vpop.permute.xlu2 %724 }
 0x179   : > { %v812_v2 = vpop.permute.xlu2 %811 }
 0x187   : > { %v1046_v59 = vpop.permute.xlu2 %1045 }
 0x18a   : > { %v2941_v35 = vpop.permute.xlu1 %649  ;;  %v2946_v50 = vpop.permute.xlu0 %647 }
 0x18b   : > { %v652_v40 = vsel %vm651_vm8, %v2946_v50, %v2941_v35  ;;  %v653_v24 = vsel %vm651_vm8, %v2941_v35, %v2946_v50  ;;  %v817_v50 = vrot.slane %v2983_v19, 2 }
 0x18c   : > { %v654_v35 = vmul.f32 %v653_v24, %v2981_v49  ;;  %v655_v26 = vmul.f32 %v652_v40, %v2983_v19 }
 0x192   : > { %v810_v9 = vpop.permute.xlu1 %809  ;;  %v727_v63 = vpop.permute.xlu0 %726 }
 0x193   : > { %v729_v3 = vsel %vm728_vm7, %v725_v58, %v727_v63  ;;  %v730_v18 = vsel %vm728_vm7, %v727_v63, %v725_v58  ;;  %v814_v27 = vsel %vm813_vm9, %v810_v9, %v812_v2  ;;  %v815_v55 = vsel %vm813_vm9, %v812_v2, %v810_v9 }
 0x194   : > { %v737_v58 = vmul.f32 %v733_v29, %v730_v18  ;;  %v738_v54 = vmul.f32 %v734_v15, %v729_v3  ;;  %v820_v12 = vmul.f32 %v816_v32, %v815_v55  ;;  %v821_v22 = vmul.f32 %v817_v50, %v814_v27 }
 0x196   : > { %v739_v20 = vadd.f32 %v737_v58, %v654_v35  ;;  %v740_v47 = vadd.f32 %v738_v54, %v655_v26 }
 0x198   : > { %v822_v14 = vadd.f32 %v820_v12, %v739_v20  ;;  %v823_v45 = vadd.f32 %v821_v22, %v740_v47  ;;  %v3281_v12 = vlaneseq }
 0x19a   : > { %v965_v25 = vpop.permute.xlu1 %964  ;;  %v892_v48 = vadd.f32 %v890_v43, %v822_v14  ;;  %v893_v42 = vadd.f32 %v891_v17, %v823_v45  ;;  %vm1189_vm6 = vcmp.lt.s32.totalorder %v3281_v12, 256 }
 0x1a3   : > { %v1131_v44 = vpop.permute.xlu2 %1130 }
 0x1a8   : > { %v963_v52 = vpop.permute.xlu0 %962 }
 0x1a9   : > { %v967_v36 = vsel %vm966_vm10, %v963_v52, %v965_v25  ;;  %v968_v9 = vsel %vm966_vm10, %v965_v25, %v963_v52 }
 0x1aa   : > { %v973_v2 = vmul.f32 %v969_v23, %v967_v36  ;;  %v974_v63 = vmul.f32 %v970_v38, %v968_v9 }
 0x1ac   : > { %v975_v39 = vadd.f32 %v973_v2, %v892_v48  ;;  %v976_v33 = vadd.f32 %v974_v63, %v893_v42 }
 0x1b1   : > { %v1129_v34 = vpop.permute.xlu1 %1128 }
 0x1b2   : > { %v1133_v15 = vsel %vm1132_vm11, %v1129_v34, %v1131_v44  ;;  %v1134_v28 = vsel %vm1132_vm11, %v1131_v44, %v1129_v34 }
 0x1b3   : > { %v1139_v4 = vmul.f32 %v1135_v37, %v1133_v15  ;;  %v1140_v53 = vmul.f32 %v1136_v8, %v1134_v28 }
 0x1c1   : > { %v1048_v29 = vpop.permute.xlu0 %1047 }
 0x1c2   : > { %v1050_v3 = vsel %vm1049_vm12, %v1046_v59, %v1048_v29  ;;  %v1051_v18 = vsel %vm1049_vm12, %v1048_v29, %v1046_v59 }
 0x1c3   : > { %v1056_v1 = vmul.f32 %v1052_v6, %v1050_v3  ;;  %v1057_v10 = vmul.f32 %v1053_v13, %v1051_v18 }
 0x1c5   : > { %v1058_v30 = vadd.f32 %v1056_v1, %v975_v39  ;;  %v1059_v40 = vadd.f32 %v1057_v10, %v976_v33 }
 0x1c7   : > { %v1141_v24 = vadd.f32 %v1139_v4, %v1058_v30  ;;  %v1142_v7 = vadd.f32 %v1140_v53, %v1059_v40 }
 0x1c9   : > { %v1433_v21 = vmul.f32 -1.442695, %v1141_v24  ;;  %v1434_v49 = vmul.f32 -1.442695, %v1142_v7 }
 0x1cb   : > { %1545 = vpow2.f32 %v1433_v21 }
 0x1cc   : > { %1547 = vpow2.f32 %v1434_v49 }
 0x1d1   : > { %v1546_v19 = vpop.eup %1545 }
 0x1d2   : > { %v1548_v58 = vpop.eup %1547  ;;  %v1149_v54 = vadd.f32 1.0, %v1546_v19 }
 0x1d3   : > { %v1150_v25 = vadd.f32 1.0, %v1548_v58 }
 0x1d4   : > { %1549 = vrcp.f32 %v1149_v54  ;;  %vm1156_vm15 = vweird.f32 %v1149_v54  ;;  %v1162_v27 = vand.u32 2147483648, %v1149_v54  ;;  %v1160_v56 = vand.u32 2147483647, %v1149_v54 }
 0x1d5   : > { %1551 = vrcp.f32 %v1150_v25  ;;  %v1177_v26 = vand.u32 2147483648, %v1150_v25  ;;  %v1175_v50 = vand.u32 2147483647, %v1150_v25  ;;  %vm1171_vm1 = vweird.f32 %v1150_v25 }
 0x1d6   : > { %v1163_v5 = vor.u32 1.1754944e-38, %v1162_v27  ;;  %vm1161_vm5 = vcmp.eq.f32.partialorder %v1160_v56, 8.507059e+37 }
 0x1d7   : > { %v1178_v20 = vor.u32 1.1754944e-38, %v1177_v26  ;;  %vm1176_vm3 = vcmp.eq.f32.partialorder %v1175_v50, 8.507059e+37 }
 0x1da   : > { %v1550_v62 = vpop.eup %1549 }
 0x1db   : > { %v1552_v61 = vpop.eup %1551  ;;  %v1152_v46 = vmul.f32 %v1550_v62, %v1149_v54  ;;  %vm1157_vm13 = vweird.f32 %v1550_v62 }
 0x1dc   : > { %v1167_v41 = vmul.f32 %v1552_v61, %v1150_v25  ;;  %vm1172_vm14 = vweird.f32 %v1552_v61  ;;  %vm3029_vm0 = vmor %vm1156_vm15, %vm1157_vm13 }
 0x1dd   : > { %v1153_v57 = vsub.f32 1.0, %v1152_v46  ;;  %vm1173_vm2 = vmor %vm1171_vm1, %vm1172_vm14 }
 0x1de   : > { %v1168_v59 = vsub.f32 1.0, %v1167_v41 }
 0x1df   : > { %v1154_v35 = vmul.f32 %v1550_v62, %v1153_v57 }
 0x1e0   : > { %v1169_v32 = vmul.f32 %v1552_v61, %v1168_v59 }
 0x1e1   : > { %v1155_v52 = vadd.f32 %v1550_v62, %v1154_v35 }
 0x1e2   : > { %v1170_v16 = vadd.f32 %v1552_v61, %v1169_v32 }
 0x1e3   : > { %v1159_v47 = vsel %vm3029_vm0, %v1550_v62, %v1155_v52 }
 0x1e4   : > { %v1174_v0 = vsel %vm1173_vm2, %v1552_v61, %v1170_v16  ;;  %v1164_v22 = vsel %vm1161_vm5, %v1163_v5, %v1159_v47 }
 0x1e5   : > { %v1179_v51 = vsel %vm1176_vm3, %v1178_v20, %v1174_v0 }
 0x1e6   : > { %v1183_v11 = vrot.slane %v1179_v51, 7 }
 0x1e8   : > { %v1185_v23 = vsel %vm1184_vm4, %v1164_v22, %v1183_v11 }
 0x1e9   : > { %1191 = vst.msk [vmem:[%s272_s18] sm:$0x3] %vm1189_vm6, %v1185_v23 }
 0x1ea   : > { %1685 = shalt.err (!%p1682_p0)
}
 0x1eb   : > { %1454 = dma.vmem_to_hbm [thread:$0]  (%p1869_p3), %s1206_s28, 32, %s1208_s8, %s1193_s3  }
 0x1ec PF: > { %s3282_s23 = sld [smem:[#allocation18_spill]]  ;;  %p1471_p5 = pnand %p1326_p9, %p1839_p6 }
 0x1ed   : > { %s3284_s7 = sld [smem:[#allocation23_spill]] }
 0x1ee   : > { %p1472_p7 = pneg %p1471_p5 }
 0x1f2   : > { %s1219_s9 = sand.u32 1, %s3282_s23  }
 0x1f3   : > { %s1220_s11 = scalar_lea.sflag [#allocation6], %s1219_s9 }
 0x1f4   : > { %1727 = dma.done.wait (%p1472_p7), %s1220_s11, 32  }
 0x1f5   : > { %1729 = vsyncadd (%p1472_p7), %s1220_s11, 4294967264  ;;  %s20_s20 = sadd.s32 1, %s3284_s7   ;;  %s3285_s15 = sld [smem:[#allocation19_spill]] }
 0x1f6   : > { %p17_p10 = scmp.ge.s32.totalorder %s20_s20, 4   ;;  %s3286_s16 = sld [smem:[#allocation20_spill]] }
 0x1f7   : > { %s3287_s17 = sld [smem:[#allocation27_spill]] }
 0x1f8   : > { %s3288_s18 = sld [smem:[#allocation22_spill]]  ;;  %19 = sbr.rel (!%p17_p10) target bundleno = 13 (0xd), region = 101 }
 0x1f9   : > { %s3289_s19 = sld [smem:[#allocation26_spill]] }
 0x1fd   :  { %1226 = vsyncpa [#allocation5], 1 }
 0x1fe   :  { %1228 = vsyncpa [#allocation5 + $0x1], 1 }
 0x1ff   :  { %1229 = vsyncpa [#allocation10], 1 }
 0x200   :  { %1230 = vsyncpa [#allocation6], 1 }
 0x201   :  { %1232 = vsyncpa [#allocation6 + $0x1], 1 }
 0x202   :  { %1233 = vsyncpa [#allocation7], 1 }
 0x203   :  { %1235 = vsyncpa [#allocation7 + $0x1], 1 }

</bundles_post_ra>
